<compile_context>
chip_gen: v7x
topology: tpu7x:2x2x1
jax: 0.10.0
libtpu: 0.0.40
codegen_flags: <defaults>
</compile_context>

<pallas_src>
import math

import jax
import jax.numpy as jnp
from jax.experimental import pallas as pl
from jax.experimental.pallas import tpu as pltpu


def make_mha_kernel(nheads: int, e_head: int):
    e_total = nheads * e_head

    def kernel(xq_ref, xkv_ref, wq_ref, bq_ref, wkv_ref, bkv_ref,
               wo_ref, bo_ref, o_ref, q_sc, m_sc, l_sc, acc_sc):
        # xq_ref : (tq, D_in)   query-tile rows of the embedding
        # xkv_ref: (tk, D_in)   kv-tile rows of the embedding
        # wq_ref : (D_in, E_total)     Q projection (softmax scale pre-folded)
        # bq_ref : (1, E_total)
        # wkv_ref: (D_in, 2*E_total)   packed K|V projection
        # bkv_ref: (1, 2*E_total)
        # wo_ref : (E_total, D_out)
        # bo_ref : (1, D_out)
        # o_ref  : (tq, D_out)
        ki = pl.program_id(2)

        @pl.when(ki == 0)
        def _init():
            # Q projection for this q-tile, computed once per (batch, q-tile).
            q_sc[...] = (jnp.dot(xq_ref[...], wq_ref[...],
                                 preferred_element_type=jnp.float32)
                         + bq_ref[...])
            m_sc[...] = jnp.full(m_sc.shape, -jnp.inf, jnp.float32)
            l_sc[...] = jnp.zeros(l_sc.shape, jnp.float32)
            acc_sc[...] = jnp.zeros(acc_sc.shape, jnp.float32)

        # K/V projection for this kv-tile: columns [0, E) = K, [E, 2E) = V.
        # TODO(synk): for production D_in (e.g. 4096) also K-tile this weight
        # and cast operands to bf16 (f32 accumulation) for the 256-wide MXU.
        kv = (jnp.dot(xkv_ref[...], wkv_ref[...],
                      preferred_element_type=jnp.float32) + bkv_ref[...])

        # Per-head online-softmax attention.  Heads live at lane offsets
        # h*e_head inside the (tile, E_total) slabs — no 3-D transposes.
        for h in range(nheads):
            lo = h * e_head
            qh = q_sc[:, lo:lo + e_head]                          # (tq, Eh)
            kh = kv[:, lo:lo + e_head]                            # (tk, Eh)
            vh = kv[:, e_total + lo:e_total + lo + e_head]        # (tk, Eh)

            s = jnp.dot(qh, kh.T,
                        preferred_element_type=jnp.float32)       # (tq, tk)
            m_prev = m_sc[h]                                      # (tq, 1)
            m_new = jnp.maximum(m_prev, jnp.max(s, axis=-1, keepdims=True))
            alpha = jnp.exp(m_prev - m_new)
            p = jnp.exp(s - m_new)
            l_sc[h] = alpha * l_sc[h] + jnp.sum(p, axis=-1, keepdims=True)
            acc_sc[:, lo:lo + e_head] = (
                alpha * acc_sc[:, lo:lo + e_head]
                + jnp.dot(p, vh, preferred_element_type=jnp.float32))
            m_sc[h] = m_new

        @pl.when(ki == pl.num_programs(2) - 1)
        def _finalize():
            # Normalize each head (EUP approximate reciprocal), heads are
            # already contiguous along lanes -> merge is free, then project.
            for h in range(nheads):
                lo = h * e_head
                inv_l = pl.reciprocal(l_sc[h], approx=True)       # (tq, 1)
                acc_sc[:, lo:lo + e_head] = acc_sc[:, lo:lo + e_head] * inv_l
            out = (jnp.dot(acc_sc[...], wo_ref[...],
                           preferred_element_type=jnp.float32) + bo_ref[...])
            # TODO(synk): D_out < 128 makes this a masked vst; production
            # configs should keep D_out a multiple of 128 for lane-dense stores.
            o_ref[...] = out.astype(o_ref.dtype)

    return kernel


def multi_head_attention(x, w_packed, b_packed, w_out, b_out, *,
                         nheads, e_head, q_tile=128, kv_tile=128):
    """x: (N, L, D_in); w_packed: (D_in, 3*E_total) (pre-transposed);
    b_packed: (3*E_total,); w_out: (E_total, D_out); b_out: (D_out,)."""
    N, L, D_in = x.shape
    e_total = nheads * e_head
    D_out = w_out.shape[1]
    assert w_packed.shape == (D_in, 3 * e_total)
    assert b_packed.shape == (3 * e_total,)
    assert w_out.shape == (e_total, D_out)
    assert b_out.shape == (D_out,)

    tq = min(q_tile, L)
    tk = min(kv_tile, L)
    assert L % tq == 0 and L % tk == 0, "L must be divisible by the tile sizes"
    assert tq == L or tq % 8 == 0
    assert tk == L or tk % 8 == 0
    n_q = L // tq
    n_kv = L // tk

    # Split the packed projection into Q and K|V halves and fold the softmax
    # scale 1/sqrt(E_head) into the Q weights/bias on the host.
    scale = 1.0 / math.sqrt(e_head)
    wq = (w_packed[:, :e_total] * scale).astype(x.dtype)
    bq = (b_packed[:e_total] * scale).reshape(1, e_total).astype(x.dtype)
    wkv = w_packed[:, e_total:]
    bkv = b_packed[e_total:].reshape(1, 2 * e_total)
    bo = b_out.reshape(1, D_out)

    kernel = make_mha_kernel(nheads, e_head)

    return pl.pallas_call(
        kernel,
        out_shape=jax.ShapeDtypeStruct((N, L, D_out), x.dtype),
        grid_spec=pltpu.PrefetchScalarGridSpec(
            num_scalar_prefetch=0,
            grid=(N, n_q, n_kv),
            in_specs=[
                # query-tile rows of x (leading batch dim squeezed away)
                pl.BlockSpec((pl.Squeezed(), tq, D_in),
                             lambda n, qi, ki: (n, qi, 0)),
                # kv-tile rows of x
                pl.BlockSpec((pl.Squeezed(), tk, D_in),
                             lambda n, qi, ki: (n, ki, 0)),
                pl.BlockSpec((D_in, e_total), lambda n, qi, ki: (0, 0)),      # wq
                pl.BlockSpec((1, e_total), lambda n, qi, ki: (0, 0)),         # bq
                pl.BlockSpec((D_in, 2 * e_total), lambda n, qi, ki: (0, 0)),  # wkv
                pl.BlockSpec((1, 2 * e_total), lambda n, qi, ki: (0, 0)),     # bkv
                pl.BlockSpec((e_total, D_out), lambda n, qi, ki: (0, 0)),     # wo
                pl.BlockSpec((1, D_out), lambda n, qi, ki: (0, 0)),           # bo
            ],
            out_specs=pl.BlockSpec((pl.Squeezed(), tq, D_out),
                                   lambda n, qi, ki: (n, qi, 0)),
            scratch_shapes=[
                pltpu.VMEM((tq, e_total), jnp.float32),    # cached (scaled) Q tile
                pltpu.VMEM((nheads, tq, 1), jnp.float32),  # running max per head
                pltpu.VMEM((nheads, tq, 1), jnp.float32),  # running denom per head
                pltpu.VMEM((tq, e_total), jnp.float32),    # output accumulator
            ],
        ),
        compiler_params=pltpu.CompilerParams(
            dimension_semantics=("parallel", "parallel", "arbitrary"),
            vmem_limit_bytes=32 * 1024 * 1024,
        ),
    )(x, x, wq, bq, wkv, bkv, w_out, bo)


def reference_mha(x, w_packed, b_packed, w_out, b_out, *, nheads, e_head):
    """Pure-JAX reference mirroring the PyTorch forward (dropout=0)."""
    N, L, _ = x.shape
    e_total = nheads * e_head
    packed = jnp.einsum('nld,de->nle', x, w_packed) + b_packed[None, None, :]
    q, k, v = jnp.split(packed, 3, axis=-1)

    def split_heads(t):
        return t.reshape(N, L, nheads, e_head).transpose(0, 2, 1, 3)

    q, k, v = split_heads(q), split_heads(k), split_heads(v)
    s = jnp.einsum('nhqd,nhkd->nhqk', q, k) / math.sqrt(e_head)
    p = jax.nn.softmax(s, axis=-1)
    a = jnp.einsum('nhqk,nhkd->nhqd', p, v)
    a = a.transpose(0, 2, 1, 3).reshape(N, L, e_total)
    return jnp.einsum('nle,eo->nlo', a, w_out) + b_out[None, None, :]


if __name__ == "__main__":
    # cfg-equivalent hyperparameters (small, deterministic).  L=16 with 8-wide
    # q/kv tiles exercises the multi-tile online-softmax path (grid (2,2,2)).
    N, L = 2, 16
    input_size = 32
    output_size = 32
    nheads = 4
    E_head = 8
    E_total = nheads * E_head   # 32
    # dropout = 0.0 (inference), bias = True

    key = jax.random.PRNGKey(0)
    kx, kw1, kb1, kw2, kb2 = jax.random.split(key, 5)

    x = jax.random.normal(kx, (N, L, input_size), dtype=jnp.float32)

    # nn.Linear(input_size, 3*E_total): stored pre-transposed (input_size, 3*E_total).
    lim1 = 1.0 / math.sqrt(input_size)
    w_packed = jax.random.uniform(kw1, (input_size, 3 * E_total),
                                  minval=-lim1, maxval=lim1, dtype=jnp.float32)
    b_packed = jax.random.uniform(kb1, (3 * E_total,),
                                  minval=-lim1, maxval=lim1, dtype=jnp.float32)

    # nn.Linear(E_total, output_size): stored pre-transposed (E_total, output_size).
    lim2 = 1.0 / math.sqrt(E_total)
    w_out = jax.random.uniform(kw2, (E_total, output_size),
                               minval=-lim2, maxval=lim2, dtype=jnp.float32)
    b_out = jax.random.uniform(kb2, (output_size,),
                               minval=-lim2, maxval=lim2, dtype=jnp.float32)

    out = multi_head_attention(x, w_packed, b_packed, w_out, b_out,
                               nheads=nheads, e_head=E_head,
                               q_tile=8, kv_tile=8)
    out = jax.block_until_ready(out)

    ref = reference_mha(x, w_packed, b_packed, w_out, b_out,
                        nheads=nheads, e_head=E_head)
    assert out.shape == (N, L, output_size)
    max_err = jnp.max(jnp.abs(out - ref))
    # Tolerance accounts for the EUP approximate reciprocal in the softmax
    # denominator and the host-folded Q scale.
    assert jnp.allclose(out, ref, atol=2e-3, rtol=2e-3), \
        f"mismatch vs reference (max abs err {max_err})"

    print("KERNEL_OK")
</pallas_src>

<mosaic_0001>
module attributes {stable_mosaic.version = 11 : i64} {
  func.func @kernel(%arg0: i32, %arg1: i32, %arg2: i32, %arg3: memref<1x8x32xf32, #tpu.memory_space<vmem>>, %arg4: memref<1x8x32xf32, #tpu.memory_space<vmem>>, %arg5: memref<32x32xf32, #tpu.memory_space<vmem>>, %arg6: memref<1x32xf32, #tpu.memory_space<vmem>>, %arg7: memref<32x64xf32, #tpu.memory_space<vmem>>, %arg8: memref<1x64xf32, #tpu.memory_space<vmem>>, %arg9: memref<32x32xf32, #tpu.memory_space<vmem>>, %arg10: memref<1x32xf32, #tpu.memory_space<vmem>>, %arg11: memref<1x8x32xf32, #tpu.memory_space<vmem>>, %arg12: memref<8x32xf32, #tpu.memory_space<vmem>>, %arg13: memref<4x8x1xf32, #tpu.memory_space<vmem>>, %arg14: memref<4x8x1xf32, #tpu.memory_space<vmem>>, %arg15: memref<8x32xf32, #tpu.memory_space<vmem>>) attributes {dimension_semantics = [#tpu.dimension_semantics<parallel>, #tpu.dimension_semantics<parallel>, #tpu.dimension_semantics<arbitrary>], iteration_bounds = array<i64: 2, 2, 2>, scalar_prefetch = 0 : i64, scratch_operands = 4 : i64, tpu.core_type = #tpu.core_type<tc>, window_params = [{transform_indices = @transform_0, window_bounds = array<i64: 1, 8, 32>}, {transform_indices = @transform_1, window_bounds = array<i64: 1, 8, 32>}, {pipeline_mode = #tpu.pipeline_mode<synchronous>, transform_indices = @transform_2, window_bounds = array<i64: 32, 32>}, {pipeline_mode = #tpu.pipeline_mode<synchronous>, transform_indices = @transform_3, window_bounds = array<i64: 1, 32>}, {pipeline_mode = #tpu.pipeline_mode<synchronous>, transform_indices = @transform_4, window_bounds = array<i64: 32, 64>}, {pipeline_mode = #tpu.pipeline_mode<synchronous>, transform_indices = @transform_5, window_bounds = array<i64: 1, 64>}, {pipeline_mode = #tpu.pipeline_mode<synchronous>, transform_indices = @transform_6, window_bounds = array<i64: 32, 32>}, {pipeline_mode = #tpu.pipeline_mode<synchronous>, transform_indices = @transform_7, window_bounds = array<i64: 1, 32>}, {transform_indices = @transform_8, window_bounds = array<i64: 1, 8, 32>}]} {
    %c0_i32 = arith.constant 0 : i32
    %0 = arith.cmpi eq, %arg2, %c0_i32 : i32
    %1 = arith.extui %0 : i1 to i32
    %c0_i32_0 = arith.constant 0 : i32
    %2 = arith.cmpi ne, %1, %c0_i32_0 : i32
    scf.if %2 {
      %c0_90 = arith.constant 0 : index
      %c0_91 = arith.constant 0 : index
      %c0_92 = arith.constant 0 : index
      %145 = vector.load %arg3[%c0_90, %c0_91, %c0_92] : memref<1x8x32xf32, #tpu.memory_space<vmem>>, vector<1x8x32xf32>
      %146 = vector.shape_cast %145 : vector<1x8x32xf32> to vector<8x32xf32>
      %c0_93 = arith.constant 0 : index
      %c0_94 = arith.constant 0 : index
      %147 = vector.load %arg5[%c0_93, %c0_94] : memref<32x32xf32, #tpu.memory_space<vmem>>, vector<32x32xf32>
      %cst_95 = arith.constant dense<0.000000e+00> : vector<8x32xf32>
      %148 = tpu.matmul %146, %147, %cst_95 {dimension_numbers = #tpu.dot_dimension_numbers<[1], [0], [0], [1], [0, 0, 1, 1], [], []>} : vector<8x32xf32>, vector<32x32xf32>, vector<8x32xf32> -> vector<8x32xf32>
      %c0_96 = arith.constant 0 : index
      %c0_97 = arith.constant 0 : index
      %149 = vector.load %arg6[%c0_96, %c0_97] : memref<1x32xf32, #tpu.memory_space<vmem>>, vector<1x32xf32>
      %150 = vector.broadcast %149 : vector<1x32xf32> to vector<8x32xf32>
      %151 = arith.addf %148, %150 : vector<8x32xf32>
      %c0_98 = arith.constant 0 : index
      %c0_99 = arith.constant 0 : index
      %152 = vector.load %arg12[%c0_98, %c0_99] : memref<8x32xf32, #tpu.memory_space<vmem>>, vector<8x32xf32>
      tpu.vector_store %arg12[%c0_98, %c0_99], %151 {strides = array<i32>} : memref<8x32xf32, #tpu.memory_space<vmem>>, vector<8x32xf32>,
      %cst_100 = arith.constant 0xFF800000 : f32
      %153 = vector.broadcast %cst_100 : f32 to vector<4x8x1xf32>
      %c0_101 = arith.constant 0 : index
      %c0_102 = arith.constant 0 : index
      %c0_103 = arith.constant 0 : index
      %154 = vector.load %arg13[%c0_101, %c0_102, %c0_103] : memref<4x8x1xf32, #tpu.memory_space<vmem>>, vector<4x8x1xf32>
      tpu.vector_store %arg13[%c0_101, %c0_102, %c0_103], %153 {strides = array<i32>} : memref<4x8x1xf32, #tpu.memory_space<vmem>>, vector<4x8x1xf32>,
      %cst_104 = arith.constant 0.000000e+00 : f32
      %155 = vector.broadcast %cst_104 : f32 to vector<4x8x1xf32>
      %c0_105 = arith.constant 0 : index
      %c0_106 = arith.constant 0 : index
      %c0_107 = arith.constant 0 : index
      %156 = vector.load %arg14[%c0_105, %c0_106, %c0_107] : memref<4x8x1xf32, #tpu.memory_space<vmem>>, vector<4x8x1xf32>
      tpu.vector_store %arg14[%c0_105, %c0_106, %c0_107], %155 {strides = array<i32>} : memref<4x8x1xf32, #tpu.memory_space<vmem>>, vector<4x8x1xf32>,
      %cst_108 = arith.constant 0.000000e+00 : f32
      %157 = vector.broadcast %cst_108 : f32 to vector<8x32xf32>
      %c0_109 = arith.constant 0 : index
      %c0_110 = arith.constant 0 : index
      %158 = vector.load %arg15[%c0_109, %c0_110] : memref<8x32xf32, #tpu.memory_space<vmem>>, vector<8x32xf32>
      tpu.vector_store %arg15[%c0_109, %c0_110], %157 {strides = array<i32>} : memref<8x32xf32, #tpu.memory_space<vmem>>, vector<8x32xf32>,
    } else {
    }
    %c0 = arith.constant 0 : index
    %c0_1 = arith.constant 0 : index
    %c0_2 = arith.constant 0 : index
    %3 = vector.load %arg4[%c0, %c0_1, %c0_2] : memref<1x8x32xf32, #tpu.memory_space<vmem>>, vector<1x8x32xf32>
    %4 = vector.shape_cast %3 : vector<1x8x32xf32> to vector<8x32xf32>
    %c0_3 = arith.constant 0 : index
    %c0_4 = arith.constant 0 : index
    %5 = vector.load %arg7[%c0_3, %c0_4] : memref<32x64xf32, #tpu.memory_space<vmem>>, vector<32x64xf32>
    %cst = arith.constant dense<0.000000e+00> : vector<8x64xf32>
    %6 = tpu.matmul %4, %5, %cst {dimension_numbers = #tpu.dot_dimension_numbers<[1], [0], [0], [1], [0, 0, 1, 1], [], []>} : vector<8x32xf32>, vector<32x64xf32>, vector<8x64xf32> -> vector<8x64xf32>
    %c0_5 = arith.constant 0 : index
    %c0_6 = arith.constant 0 : index
    %7 = vector.load %arg8[%c0_5, %c0_6] : memref<1x64xf32, #tpu.memory_space<vmem>>, vector<1x64xf32>
    %8 = vector.broadcast %7 : vector<1x64xf32> to vector<8x64xf32>
    %9 = arith.addf %6, %8 : vector<8x64xf32>
    %c0_7 = arith.constant 0 : index
    %c0_8 = arith.constant 0 : index
    %10 = vector.load %arg12[%c0_7, %c0_8] : memref<8x32xf32, #tpu.memory_space<vmem>>, vector<8x8xf32>
    %11 = vector.extract_strided_slice %9 {offsets = [0, 0], sizes = [8, 8], strides = [1, 1]} : vector<8x64xf32> to vector<8x8xf32>
    %12 = vector.extract_strided_slice %9 {offsets = [0, 32], sizes = [8, 8], strides = [1, 1]} : vector<8x64xf32> to vector<8x8xf32>
    %13 = tpu.transpose %11, [1, 0] : vector<8x8xf32> -> vector<8x8xf32>
    %cst_9 = arith.constant dense<0.000000e+00> : vector<8x8xf32>
    %14 = tpu.matmul %10, %13, %cst_9 {dimension_numbers = #tpu.dot_dimension_numbers<[1], [0], [0], [1], [0, 0, 1, 1], [], []>} : vector<8x8xf32>, vector<8x8xf32>, vector<8x8xf32> -> vector<8x8xf32>
    %c0_10 = arith.constant 0 : index
    %c0_11 = arith.constant 0 : index
    %c0_12 = arith.constant 0 : index
    %15 = vector.load %arg13[%c0_10, %c0_11, %c0_12] : memref<4x8x1xf32, #tpu.memory_space<vmem>>, vector<1x8x1xf32>
    %16 = vector.shape_cast %15 : vector<1x8x1xf32> to vector<8x1xf32>
    %cst_13 = arith.constant dense<0xFF800000> : vector<8xf32>
    %17 = vector.multi_reduction <maximumf>, %14, %cst_13 [1] : vector<8x8xf32> to vector<8xf32>
    %18 = vector.shape_cast %17 : vector<8xf32> to vector<8x1xf32>
    %19 = arith.maximumf %16, %18 : vector<8x1xf32>
    %20 = arith.subf %16, %19 : vector<8x1xf32>
    %21 = math.exp %20 : vector<8x1xf32>
    %22 = vector.broadcast %19 : vector<8x1xf32> to vector<8x8xf32>
    %23 = arith.subf %14, %22 : vector<8x8xf32>
    %24 = math.exp %23 : vector<8x8xf32>
    %c0_14 = arith.constant 0 : index
    %c0_15 = arith.constant 0 : index
    %c0_16 = arith.constant 0 : index
    %25 = vector.load %arg14[%c0_14, %c0_15, %c0_16] : memref<4x8x1xf32, #tpu.memory_space<vmem>>, vector<1x8x1xf32>
    %26 = vector.shape_cast %25 : vector<1x8x1xf32> to vector<8x1xf32>
    %27 = arith.mulf %21, %26 : vector<8x1xf32>
    %cst_17 = arith.constant dense<0.000000e+00> : vector<8xf32>
    %28 = vector.multi_reduction <add>, %24, %cst_17 [1] : vector<8x8xf32> to vector<8xf32>
    %29 = vector.shape_cast %28 : vector<8xf32> to vector<8x1xf32>
    %30 = arith.addf %27, %29 : vector<8x1xf32>
    %c0_18 = arith.constant 0 : index
    %c0_19 = arith.constant 0 : index
    %c0_20 = arith.constant 0 : index
    %31 = vector.load %arg14[%c0_18, %c0_19, %c0_20] : memref<4x8x1xf32, #tpu.memory_space<vmem>>, vector<1x8x1xf32>
    %32 = vector.shape_cast %31 : vector<1x8x1xf32> to vector<8x1xf32>
    %33 = vector.shape_cast %30 : vector<8x1xf32> to vector<1x8x1xf32>
    tpu.vector_store %arg14[%c0_18, %c0_19, %c0_20], %33 {strides = array<i32>} : memref<4x8x1xf32, #tpu.memory_space<vmem>>, vector<1x8x1xf32>,
    %c0_21 = arith.constant 0 : index
    %c0_22 = arith.constant 0 : index
    %34 = vector.load %arg15[%c0_21, %c0_22] : memref<8x32xf32, #tpu.memory_space<vmem>>, vector<8x8xf32>
    %35 = vector.broadcast %21 : vector<8x1xf32> to vector<8x8xf32>
    %36 = arith.mulf %35, %34 : vector<8x8xf32>
    %cst_23 = arith.constant dense<0.000000e+00> : vector<8x8xf32>
    %37 = tpu.matmul %24, %12, %cst_23 {dimension_numbers = #tpu.dot_dimension_numbers<[1], [0], [0], [1], [0, 0, 1, 1], [], []>} : vector<8x8xf32>, vector<8x8xf32>, vector<8x8xf32> -> vector<8x8xf32>
    %38 = arith.addf %36, %37 : vector<8x8xf32>
    %c0_24 = arith.constant 0 : index
    %c0_25 = arith.constant 0 : index
    %39 = vector.load %arg15[%c0_24, %c0_25] : memref<8x32xf32, #tpu.memory_space<vmem>>, vector<8x8xf32>
    tpu.vector_store %arg15[%c0_24, %c0_25], %38 {strides = array<i32>} : memref<8x32xf32, #tpu.memory_space<vmem>>, vector<8x8xf32>,
    %c0_26 = arith.constant 0 : index
    %c0_27 = arith.constant 0 : index
    %c0_28 = arith.constant 0 : index
    %40 = vector.load %arg13[%c0_26, %c0_27, %c0_28] : memref<4x8x1xf32, #tpu.memory_space<vmem>>, vector<1x8x1xf32>
    %41 = vector.shape_cast %40 : vector<1x8x1xf32> to vector<8x1xf32>
    %42 = vector.shape_cast %19 : vector<8x1xf32> to vector<1x8x1xf32>
    tpu.vector_store %arg13[%c0_26, %c0_27, %c0_28], %42 {strides = array<i32>} : memref<4x8x1xf32, #tpu.memory_space<vmem>>, vector<1x8x1xf32>,
    %c0_29 = arith.constant 0 : index
    %c8 = arith.constant 8 : index
    %43 = vector.load %arg12[%c0_29, %c8] : memref<8x32xf32, #tpu.memory_space<vmem>>, vector<8x8xf32>
    %44 = vector.extract_strided_slice %9 {offsets = [0, 8], sizes = [8, 8], strides = [1, 1]} : vector<8x64xf32> to vector<8x8xf32>
    %45 = vector.extract_strided_slice %9 {offsets = [0, 40], sizes = [8, 8], strides = [1, 1]} : vector<8x64xf32> to vector<8x8xf32>
    %46 = tpu.transpose %44, [1, 0] : vector<8x8xf32> -> vector<8x8xf32>
    %cst_30 = arith.constant dense<0.000000e+00> : vector<8x8xf32>
    %47 = tpu.matmul %43, %46, %cst_30 {dimension_numbers = #tpu.dot_dimension_numbers<[1], [0], [0], [1], [0, 0, 1, 1], [], []>} : vector<8x8xf32>, vector<8x8xf32>, vector<8x8xf32> -> vector<8x8xf32>
    %c1 = arith.constant 1 : index
    %c0_31 = arith.constant 0 : index
    %c0_32 = arith.constant 0 : index
    %48 = vector.load %arg13[%c1, %c0_31, %c0_32] : memref<4x8x1xf32, #tpu.memory_space<vmem>>, vector<1x8x1xf32>
    %49 = vector.shape_cast %48 : vector<1x8x1xf32> to vector<8x1xf32>
    %cst_33 = arith.constant dense<0xFF800000> : vector<8xf32>
    %50 = vector.multi_reduction <maximumf>, %47, %cst_33 [1] : vector<8x8xf32> to vector<8xf32>
    %51 = vector.shape_cast %50 : vector<8xf32> to vector<8x1xf32>
    %52 = arith.maximumf %49, %51 : vector<8x1xf32>
    %53 = arith.subf %49, %52 : vector<8x1xf32>
    %54 = math.exp %53 : vector<8x1xf32>
    %55 = vector.broadcast %52 : vector<8x1xf32> to vector<8x8xf32>
    %56 = arith.subf %47, %55 : vector<8x8xf32>
    %57 = math.exp %56 : vector<8x8xf32>
    %c1_34 = arith.constant 1 : index
    %c0_35 = arith.constant 0 : index
    %c0_36 = arith.constant 0 : index
    %58 = vector.load %arg14[%c1_34, %c0_35, %c0_36] : memref<4x8x1xf32, #tpu.memory_space<vmem>>, vector<1x8x1xf32>
    %59 = vector.shape_cast %58 : vector<1x8x1xf32> to vector<8x1xf32>
    %60 = arith.mulf %54, %59 : vector<8x1xf32>
    %cst_37 = arith.constant dense<0.000000e+00> : vector<8xf32>
    %61 = vector.multi_reduction <add>, %57, %cst_37 [1] : vector<8x8xf32> to vector<8xf32>
    %62 = vector.shape_cast %61 : vector<8xf32> to vector<8x1xf32>
    %63 = arith.addf %60, %62 : vector<8x1xf32>
    %c1_38 = arith.constant 1 : index
    %c0_39 = arith.constant 0 : index
    %c0_40 = arith.constant 0 : index
    %64 = vector.load %arg14[%c1_38, %c0_39, %c0_40] : memref<4x8x1xf32, #tpu.memory_space<vmem>>, vector<1x8x1xf32>
    %65 = vector.shape_cast %64 : vector<1x8x1xf32> to vector<8x1xf32>
    %66 = vector.shape_cast %63 : vector<8x1xf32> to vector<1x8x1xf32>
    tpu.vector_store %arg14[%c1_38, %c0_39, %c0_40], %66 {strides = array<i32>} : memref<4x8x1xf32, #tpu.memory_space<vmem>>, vector<1x8x1xf32>,
    %c0_41 = arith.constant 0 : index
    %c8_42 = arith.constant 8 : index
    %67 = vector.load %arg15[%c0_41, %c8_42] : memref<8x32xf32, #tpu.memory_space<vmem>>, vector<8x8xf32>
    %68 = vector.broadcast %54 : vector<8x1xf32> to vector<8x8xf32>
    %69 = arith.mulf %68, %67 : vector<8x8xf32>
    %cst_43 = arith.constant dense<0.000000e+00> : vector<8x8xf32>
    %70 = tpu.matmul %57, %45, %cst_43 {dimension_numbers = #tpu.dot_dimension_numbers<[1], [0], [0], [1], [0, 0, 1, 1], [], []>} : vector<8x8xf32>, vector<8x8xf32>, vector<8x8xf32> -> vector<8x8xf32>
    %71 = arith.addf %69, %70 : vector<8x8xf32>
    %c0_44 = arith.constant 0 : index
    %c8_45 = arith.constant 8 : index
    %72 = vector.load %arg15[%c0_44, %c8_45] : memref<8x32xf32, #tpu.memory_space<vmem>>, vector<8x8xf32>
    tpu.vector_store %arg15[%c0_44, %c8_45], %71 {strides = array<i32>} : memref<8x32xf32, #tpu.memory_space<vmem>>, vector<8x8xf32>,
    %c1_46 = arith.constant 1 : index
    %c0_47 = arith.constant 0 : index
    %c0_48 = arith.constant 0 : index
    %73 = vector.load %arg13[%c1_46, %c0_47, %c0_48] : memref<4x8x1xf32, #tpu.memory_space<vmem>>, vector<1x8x1xf32>
    %74 = vector.shape_cast %73 : vector<1x8x1xf32> to vector<8x1xf32>
    %75 = vector.shape_cast %52 : vector<8x1xf32> to vector<1x8x1xf32>
    tpu.vector_store %arg13[%c1_46, %c0_47, %c0_48], %75 {strides = array<i32>} : memref<4x8x1xf32, #tpu.memory_space<vmem>>, vector<1x8x1xf32>,
    %c0_49 = arith.constant 0 : index
    %c16 = arith.constant 16 : index
    %76 = vector.load %arg12[%c0_49, %c16] : memref<8x32xf32, #tpu.memory_space<vmem>>, vector<8x8xf32>
    %77 = vector.extract_strided_slice %9 {offsets = [0, 16], sizes = [8, 8], strides = [1, 1]} : vector<8x64xf32> to vector<8x8xf32>
    %78 = vector.extract_strided_slice %9 {offsets = [0, 48], sizes = [8, 8], strides = [1, 1]} : vector<8x64xf32> to vector<8x8xf32>
    %79 = tpu.transpose %77, [1, 0] : vector<8x8xf32> -> vector<8x8xf32>
    %cst_50 = arith.constant dense<0.000000e+00> : vector<8x8xf32>
    %80 = tpu.matmul %76, %79, %cst_50 {dimension_numbers = #tpu.dot_dimension_numbers<[1], [0], [0], [1], [0, 0, 1, 1], [], []>} : vector<8x8xf32>, vector<8x8xf32>, vector<8x8xf32> -> vector<8x8xf32>
    %c2 = arith.constant 2 : index
    %c0_51 = arith.constant 0 : index
    %c0_52 = arith.constant 0 : index
    %81 = vector.load %arg13[%c2, %c0_51, %c0_52] : memref<4x8x1xf32, #tpu.memory_space<vmem>>, vector<1x8x1xf32>
    %82 = vector.shape_cast %81 : vector<1x8x1xf32> to vector<8x1xf32>
    %cst_53 = arith.constant dense<0xFF800000> : vector<8xf32>
    %83 = vector.multi_reduction <maximumf>, %80, %cst_53 [1] : vector<8x8xf32> to vector<8xf32>
    %84 = vector.shape_cast %83 : vector<8xf32> to vector<8x1xf32>
    %85 = arith.maximumf %82, %84 : vector<8x1xf32>
    %86 = arith.subf %82, %85 : vector<8x1xf32>
    %87 = math.exp %86 : vector<8x1xf32>
    %88 = vector.broadcast %85 : vector<8x1xf32> to vector<8x8xf32>
    %89 = arith.subf %80, %88 : vector<8x8xf32>
    %90 = math.exp %89 : vector<8x8xf32>
    %c2_54 = arith.constant 2 : index
    %c0_55 = arith.constant 0 : index
    %c0_56 = arith.constant 0 : index
    %91 = vector.load %arg14[%c2_54, %c0_55, %c0_56] : memref<4x8x1xf32, #tpu.memory_space<vmem>>, vector<1x8x1xf32>
    %92 = vector.shape_cast %91 : vector<1x8x1xf32> to vector<8x1xf32>
    %93 = arith.mulf %87, %92 : vector<8x1xf32>
    %cst_57 = arith.constant dense<0.000000e+00> : vector<8xf32>
    %94 = vector.multi_reduction <add>, %90, %cst_57 [1] : vector<8x8xf32> to vector<8xf32>
    %95 = vector.shape_cast %94 : vector<8xf32> to vector<8x1xf32>
    %96 = arith.addf %93, %95 : vector<8x1xf32>
    %c2_58 = arith.constant 2 : index
    %c0_59 = arith.constant 0 : index
    %c0_60 = arith.constant 0 : index
    %97 = vector.load %arg14[%c2_58, %c0_59, %c0_60] : memref<4x8x1xf32, #tpu.memory_space<vmem>>, vector<1x8x1xf32>
    %98 = vector.shape_cast %97 : vector<1x8x1xf32> to vector<8x1xf32>
    %99 = vector.shape_cast %96 : vector<8x1xf32> to vector<1x8x1xf32>
    tpu.vector_store %arg14[%c2_58, %c0_59, %c0_60], %99 {strides = array<i32>} : memref<4x8x1xf32, #tpu.memory_space<vmem>>, vector<1x8x1xf32>,
    %c0_61 = arith.constant 0 : index
    %c16_62 = arith.constant 16 : index
    %100 = vector.load %arg15[%c0_61, %c16_62] : memref<8x32xf32, #tpu.memory_space<vmem>>, vector<8x8xf32>
    %101 = vector.broadcast %87 : vector<8x1xf32> to vector<8x8xf32>
    %102 = arith.mulf %101, %100 : vector<8x8xf32>
    %cst_63 = arith.constant dense<0.000000e+00> : vector<8x8xf32>
    %103 = tpu.matmul %90, %78, %cst_63 {dimension_numbers = #tpu.dot_dimension_numbers<[1], [0], [0], [1], [0, 0, 1, 1], [], []>} : vector<8x8xf32>, vector<8x8xf32>, vector<8x8xf32> -> vector<8x8xf32>
    %104 = arith.addf %102, %103 : vector<8x8xf32>
    %c0_64 = arith.constant 0 : index
    %c16_65 = arith.constant 16 : index
    %105 = vector.load %arg15[%c0_64, %c16_65] : memref<8x32xf32, #tpu.memory_space<vmem>>, vector<8x8xf32>
    tpu.vector_store %arg15[%c0_64, %c16_65], %104 {strides = array<i32>} : memref<8x32xf32, #tpu.memory_space<vmem>>, vector<8x8xf32>,
    %c2_66 = arith.constant 2 : index
    %c0_67 = arith.constant 0 : index
    %c0_68 = arith.constant 0 : index
    %106 = vector.load %arg13[%c2_66, %c0_67, %c0_68] : memref<4x8x1xf32, #tpu.memory_space<vmem>>, vector<1x8x1xf32>
    %107 = vector.shape_cast %106 : vector<1x8x1xf32> to vector<8x1xf32>
    %108 = vector.shape_cast %85 : vector<8x1xf32> to vector<1x8x1xf32>
    tpu.vector_store %arg13[%c2_66, %c0_67, %c0_68], %108 {strides = array<i32>} : memref<4x8x1xf32, #tpu.memory_space<vmem>>, vector<1x8x1xf32>,
    %c0_69 = arith.constant 0 : index
    %c24 = arith.constant 24 : index
    %109 = vector.load %arg12[%c0_69, %c24] : memref<8x32xf32, #tpu.memory_space<vmem>>, vector<8x8xf32>
    %110 = vector.extract_strided_slice %9 {offsets = [0, 24], sizes = [8, 8], strides = [1, 1]} : vector<8x64xf32> to vector<8x8xf32>
    %111 = vector.extract_strided_slice %9 {offsets = [0, 56], sizes = [8, 8], strides = [1, 1]} : vector<8x64xf32> to vector<8x8xf32>
    %112 = tpu.transpose %110, [1, 0] : vector<8x8xf32> -> vector<8x8xf32>
    %cst_70 = arith.constant dense<0.000000e+00> : vector<8x8xf32>
    %113 = tpu.matmul %109, %112, %cst_70 {dimension_numbers = #tpu.dot_dimension_numbers<[1], [0], [0], [1], [0, 0, 1, 1], [], []>} : vector<8x8xf32>, vector<8x8xf32>, vector<8x8xf32> -> vector<8x8xf32>
    %c3 = arith.constant 3 : index
    %c0_71 = arith.constant 0 : index
    %c0_72 = arith.constant 0 : index
    %114 = vector.load %arg13[%c3, %c0_71, %c0_72] : memref<4x8x1xf32, #tpu.memory_space<vmem>>, vector<1x8x1xf32>
    %115 = vector.shape_cast %114 : vector<1x8x1xf32> to vector<8x1xf32>
    %cst_73 = arith.constant dense<0xFF800000> : vector<8xf32>
    %116 = vector.multi_reduction <maximumf>, %113, %cst_73 [1] : vector<8x8xf32> to vector<8xf32>
    %117 = vector.shape_cast %116 : vector<8xf32> to vector<8x1xf32>
    %118 = arith.maximumf %115, %117 : vector<8x1xf32>
    %119 = arith.subf %115, %118 : vector<8x1xf32>
    %120 = math.exp %119 : vector<8x1xf32>
    %121 = vector.broadcast %118 : vector<8x1xf32> to vector<8x8xf32>
    %122 = arith.subf %113, %121 : vector<8x8xf32>
    %123 = math.exp %122 : vector<8x8xf32>
    %c3_74 = arith.constant 3 : index
    %c0_75 = arith.constant 0 : index
    %c0_76 = arith.constant 0 : index
    %124 = vector.load %arg14[%c3_74, %c0_75, %c0_76] : memref<4x8x1xf32, #tpu.memory_space<vmem>>, vector<1x8x1xf32>
    %125 = vector.shape_cast %124 : vector<1x8x1xf32> to vector<8x1xf32>
    %126 = arith.mulf %120, %125 : vector<8x1xf32>
    %cst_77 = arith.constant dense<0.000000e+00> : vector<8xf32>
    %127 = vector.multi_reduction <add>, %123, %cst_77 [1] : vector<8x8xf32> to vector<8xf32>
    %128 = vector.shape_cast %127 : vector<8xf32> to vector<8x1xf32>
    %129 = arith.addf %126, %128 : vector<8x1xf32>
    %c3_78 = arith.constant 3 : index
    %c0_79 = arith.constant 0 : index
    %c0_80 = arith.constant 0 : index
    %130 = vector.load %arg14[%c3_78, %c0_79, %c0_80] : memref<4x8x1xf32, #tpu.memory_space<vmem>>, vector<1x8x1xf32>
    %131 = vector.shape_cast %130 : vector<1x8x1xf32> to vector<8x1xf32>
    %132 = vector.shape_cast %129 : vector<8x1xf32> to vector<1x8x1xf32>
    tpu.vector_store %arg14[%c3_78, %c0_79, %c0_80], %132 {strides = array<i32>} : memref<4x8x1xf32, #tpu.memory_space<vmem>>, vector<1x8x1xf32>,
    %c0_81 = arith.constant 0 : index
    %c24_82 = arith.constant 24 : index
    %133 = vector.load %arg15[%c0_81, %c24_82] : memref<8x32xf32, #tpu.memory_space<vmem>>, vector<8x8xf32>
    %134 = vector.broadcast %120 : vector<8x1xf32> to vector<8x8xf32>
    %135 = arith.mulf %134, %133 : vector<8x8xf32>
    %cst_83 = arith.constant dense<0.000000e+00> : vector<8x8xf32>
    %136 = tpu.matmul %123, %111, %cst_83 {dimension_numbers = #tpu.dot_dimension_numbers<[1], [0], [0], [1], [0, 0, 1, 1], [], []>} : vector<8x8xf32>, vector<8x8xf32>, vector<8x8xf32> -> vector<8x8xf32>
    %137 = arith.addf %135, %136 : vector<8x8xf32>
    %c0_84 = arith.constant 0 : index
    %c24_85 = arith.constant 24 : index
    %138 = vector.load %arg15[%c0_84, %c24_85] : memref<8x32xf32, #tpu.memory_space<vmem>>, vector<8x8xf32>
    tpu.vector_store %arg15[%c0_84, %c24_85], %137 {strides = array<i32>} : memref<8x32xf32, #tpu.memory_space<vmem>>, vector<8x8xf32>,
    %c3_86 = arith.constant 3 : index
    %c0_87 = arith.constant 0 : index
    %c0_88 = arith.constant 0 : index
    %139 = vector.load %arg13[%c3_86, %c0_87, %c0_88] : memref<4x8x1xf32, #tpu.memory_space<vmem>>, vector<1x8x1xf32>
    %140 = vector.shape_cast %139 : vector<1x8x1xf32> to vector<8x1xf32>
    %141 = vector.shape_cast %118 : vector<8x1xf32> to vector<1x8x1xf32>
    tpu.vector_store %arg13[%c3_86, %c0_87, %c0_88], %141 {strides = array<i32>} : memref<4x8x1xf32, #tpu.memory_space<vmem>>, vector<1x8x1xf32>,
    %c1_i32 = arith.constant 1 : i32
    %142 = arith.cmpi eq, %arg2, %c1_i32 : i32
    %143 = arith.extui %142 : i1 to i32
    %c0_i32_89 = arith.constant 0 : i32
    %144 = arith.cmpi ne, %143, %c0_i32_89 : i32
    scf.if %144 {
      %c0_90 = arith.constant 0 : index
      %c0_91 = arith.constant 0 : index
      %c0_92 = arith.constant 0 : index
      %145 = vector.load %arg14[%c0_90, %c0_91, %c0_92] : memref<4x8x1xf32, #tpu.memory_space<vmem>>, vector<1x8x1xf32>
      %146 = vector.shape_cast %145 : vector<1x8x1xf32> to vector<8x1xf32>
      %147 = tpu.reciprocal %146 {approx = true} : vector<8x1xf32> -> vector<8x1xf32>
      %c0_93 = arith.constant 0 : index
      %c0_94 = arith.constant 0 : index
      %148 = vector.load %arg15[%c0_93, %c0_94] : memref<8x32xf32, #tpu.memory_space<vmem>>, vector<8x8xf32>
      %149 = vector.broadcast %147 : vector<8x1xf32> to vector<8x8xf32>
      %150 = arith.mulf %148, %149 : vector<8x8xf32>
      %c0_95 = arith.constant 0 : index
      %c0_96 = arith.constant 0 : index
      %151 = vector.load %arg15[%c0_95, %c0_96] : memref<8x32xf32, #tpu.memory_space<vmem>>, vector<8x8xf32>
      tpu.vector_store %arg15[%c0_95, %c0_96], %150 {strides = array<i32>} : memref<8x32xf32, #tpu.memory_space<vmem>>, vector<8x8xf32>,
      %c1_97 = arith.constant 1 : index
      %c0_98 = arith.constant 0 : index
      %c0_99 = arith.constant 0 : index
      %152 = vector.load %arg14[%c1_97, %c0_98, %c0_99] : memref<4x8x1xf32, #tpu.memory_space<vmem>>, vector<1x8x1xf32>
      %153 = vector.shape_cast %152 : vector<1x8x1xf32> to vector<8x1xf32>
      %154 = tpu.reciprocal %153 {approx = true} : vector<8x1xf32> -> vector<8x1xf32>
      %c0_100 = arith.constant 0 : index
      %c8_101 = arith.constant 8 : index
      %155 = vector.load %arg15[%c0_100, %c8_101] : memref<8x32xf32, #tpu.memory_space<vmem>>, vector<8x8xf32>
      %156 = vector.broadcast %154 : vector<8x1xf32> to vector<8x8xf32>
      %157 = arith.mulf %155, %156 : vector<8x8xf32>
      %c0_102 = arith.constant 0 : index
      %c8_103 = arith.constant 8 : index
      %158 = vector.load %arg15[%c0_102, %c8_103] : memref<8x32xf32, #tpu.memory_space<vmem>>, vector<8x8xf32>
      tpu.vector_store %arg15[%c0_102, %c8_103], %157 {strides = array<i32>} : memref<8x32xf32, #tpu.memory_space<vmem>>, vector<8x8xf32>,
      %c2_104 = arith.constant 2 : index
      %c0_105 = arith.constant 0 : index
      %c0_106 = arith.constant 0 : index
      %159 = vector.load %arg14[%c2_104, %c0_105, %c0_106] : memref<4x8x1xf32, #tpu.memory_space<vmem>>, vector<1x8x1xf32>
      %160 = vector.shape_cast %159 : vector<1x8x1xf32> to vector<8x1xf32>
      %161 = tpu.reciprocal %160 {approx = true} : vector<8x1xf32> -> vector<8x1xf32>
      %c0_107 = arith.constant 0 : index
      %c16_108 = arith.constant 16 : index
      %162 = vector.load %arg15[%c0_107, %c16_108] : memref<8x32xf32, #tpu.memory_space<vmem>>, vector<8x8xf32>
      %163 = vector.broadcast %161 : vector<8x1xf32> to vector<8x8xf32>
      %164 = arith.mulf %162, %163 : vector<8x8xf32>
      %c0_109 = arith.constant 0 : index
      %c16_110 = arith.constant 16 : index
      %165 = vector.load %arg15[%c0_109, %c16_110] : memref<8x32xf32, #tpu.memory_space<vmem>>, vector<8x8xf32>
      tpu.vector_store %arg15[%c0_109, %c16_110], %164 {strides = array<i32>} : memref<8x32xf32, #tpu.memory_space<vmem>>, vector<8x8xf32>,
      %c3_111 = arith.constant 3 : index
      %c0_112 = arith.constant 0 : index
      %c0_113 = arith.constant 0 : index
      %166 = vector.load %arg14[%c3_111, %c0_112, %c0_113] : memref<4x8x1xf32, #tpu.memory_space<vmem>>, vector<1x8x1xf32>
      %167 = vector.shape_cast %166 : vector<1x8x1xf32> to vector<8x1xf32>
      %168 = tpu.reciprocal %167 {approx = true} : vector<8x1xf32> -> vector<8x1xf32>
      %c0_114 = arith.constant 0 : index
      %c24_115 = arith.constant 24 : index
      %169 = vector.load %arg15[%c0_114, %c24_115] : memref<8x32xf32, #tpu.memory_space<vmem>>, vector<8x8xf32>
      %170 = vector.broadcast %168 : vector<8x1xf32> to vector<8x8xf32>
      %171 = arith.mulf %169, %170 : vector<8x8xf32>
      %c0_116 = arith.constant 0 : index
      %c24_117 = arith.constant 24 : index
      %172 = vector.load %arg15[%c0_116, %c24_117] : memref<8x32xf32, #tpu.memory_space<vmem>>, vector<8x8xf32>
      tpu.vector_store %arg15[%c0_116, %c24_117], %171 {strides = array<i32>} : memref<8x32xf32, #tpu.memory_space<vmem>>, vector<8x8xf32>,
      %c0_118 = arith.constant 0 : index
      %c0_119 = arith.constant 0 : index
      %173 = vector.load %arg15[%c0_118, %c0_119] : memref<8x32xf32, #tpu.memory_space<vmem>>, vector<8x32xf32>
      %c0_120 = arith.constant 0 : index
      %c0_121 = arith.constant 0 : index
      %174 = vector.load %arg9[%c0_120, %c0_121] : memref<32x32xf32, #tpu.memory_space<vmem>>, vector<32x32xf32>
      %cst_122 = arith.constant dense<0.000000e+00> : vector<8x32xf32>
      %175 = tpu.matmul %173, %174, %cst_122 {dimension_numbers = #tpu.dot_dimension_numbers<[1], [0], [0], [1], [0, 0, 1, 1], [], []>} : vector<8x32xf32>, vector<32x32xf32>, vector<8x32xf32> -> vector<8x32xf32>
      %c0_123 = arith.constant 0 : index
      %c0_124 = arith.constant 0 : index
      %176 = vector.load %arg10[%c0_123, %c0_124] : memref<1x32xf32, #tpu.memory_space<vmem>>, vector<1x32xf32>
      %177 = vector.broadcast %176 : vector<1x32xf32> to vector<8x32xf32>
      %178 = arith.addf %175, %177 : vector<8x32xf32>
      %c0_125 = arith.constant 0 : index
      %c0_126 = arith.constant 0 : index
      %c0_127 = arith.constant 0 : index
      %179 = vector.load %arg11[%c0_125, %c0_126, %c0_127] : memref<1x8x32xf32, #tpu.memory_space<vmem>>, vector<1x8x32xf32>
      %180 = vector.shape_cast %179 : vector<1x8x32xf32> to vector<8x32xf32>
      %181 = vector.shape_cast %178 : vector<8x32xf32> to vector<1x8x32xf32>
      tpu.vector_store %arg11[%c0_125, %c0_126, %c0_127], %181 {strides = array<i32>} : memref<1x8x32xf32, #tpu.memory_space<vmem>>, vector<1x8x32xf32>,
    } else {
    }
    return
  }
  func.func @transform_0(%arg0: i32, %arg1: i32, %arg2: i32) -> (i32, i32, i32) {
    %c0_i32 = arith.constant 0 : i32
    %c0_i32_0 = arith.constant 0 : i32
    return %arg0, %arg1, %c0_i32 : i32, i32, i32
  }
  func.func @transform_1(%arg0: i32, %arg1: i32, %arg2: i32) -> (i32, i32, i32) {
    %c0_i32 = arith.constant 0 : i32
    %c0_i32_0 = arith.constant 0 : i32
    return %arg0, %arg2, %c0_i32 : i32, i32, i32
  }
  func.func @transform_2(%arg0: i32, %arg1: i32, %arg2: i32) -> (i32, i32) {
    %c0_i32 = arith.constant 0 : i32
    %c0_i32_0 = arith.constant 0 : i32
    %c0_i32_1 = arith.constant 0 : i32
    return %c0_i32, %c0_i32_0 : i32, i32
  }
  func.func @transform_3(%arg0: i32, %arg1: i32, %arg2: i32) -> (i32, i32) {
    %c0_i32 = arith.constant 0 : i32
    %c0_i32_0 = arith.constant 0 : i32
    %c0_i32_1 = arith.constant 0 : i32
    return %c0_i32, %c0_i32_0 : i32, i32
  }
  func.func @transform_4(%arg0: i32, %arg1: i32, %arg2: i32) -> (i32, i32) {
    %c0_i32 = arith.constant 0 : i32
    %c0_i32_0 = arith.constant 0 : i32
    %c0_i32_1 = arith.constant 0 : i32
    return %c0_i32, %c0_i32_0 : i32, i32
  }
  func.func @transform_5(%arg0: i32, %arg1: i32, %arg2: i32) -> (i32, i32) {
    %c0_i32 = arith.constant 0 : i32
    %c0_i32_0 = arith.constant 0 : i32
    %c0_i32_1 = arith.constant 0 : i32
    return %c0_i32, %c0_i32_0 : i32, i32
  }
  func.func @transform_6(%arg0: i32, %arg1: i32, %arg2: i32) -> (i32, i32) {
    %c0_i32 = arith.constant 0 : i32
    %c0_i32_0 = arith.constant 0 : i32
    %c0_i32_1 = arith.constant 0 : i32
    return %c0_i32, %c0_i32_0 : i32, i32
  }
  func.func @transform_7(%arg0: i32, %arg1: i32, %arg2: i32) -> (i32, i32) {
    %c0_i32 = arith.constant 0 : i32
    %c0_i32_0 = arith.constant 0 : i32
    %c0_i32_1 = arith.constant 0 : i32
    return %c0_i32, %c0_i32_0 : i32, i32
  }
  func.func @transform_8(%arg0: i32, %arg1: i32, %arg2: i32) -> (i32, i32, i32) {
    %c0_i32 = arith.constant 0 : i32
    %c0_i32_0 = arith.constant 0 : i32
    return %arg0, %arg1, %c0_i32 : i32, i32, i32
  }
}

</mosaic_0001>

<bundles_post_ra>
// kernel: tpu_custom_call.1
= control target key start
LH: loop header
LB: loop body
LE: loop exit
PB: predicated region body
PF: predicated region fallthrough
CT: control target
= control target key end

     0   :  { %s2992_s0 = inlined_call_operand.hbm [shape: f32[2,16,32], index: 0, kind: input, shape index: {}]   ;;  %s2993_s1 = inlined_call_operand.hbm [shape: f32[2,16,32], index: 1, kind: input, shape index: {}]   ;;  %s2994_s2 = inlined_call_operand.hbm [shape: f32[32,32], index: 2, kind: input, shape index: {}]   ;;  %s2995_s3 = inlined_call_operand.vmem [shape: f32[1,32], index: 3, kind: input, shape index: {}]   ;;  %s2996_s4 = inlined_call_operand.hbm [shape: f32[32,64], index: 4, kind: input, shape index: {}]   ;;  %s2997_s5 = inlined_call_operand.vmem [shape: f32[1,64], index: 5, kind: input, shape index: {}]   ;;  %s2998_s6 = inlined_call_operand.hbm [shape: f32[32,32], index: 6, kind: input, shape index: {}]   ;;  %s2999_s7 = inlined_call_operand.vmem [shape: f32[1,32], index: 7, kind: input, shape index: {}]   ;;  %s3000_s8 = inlined_call_operand.hbm [shape: f32[2,16,32], index: 8, kind: output, shape index: {}]  }
   0x1   :  { %3016 = sst [smem:[#allocation30_spill]] %s2993_s1 }
   0x2   :  { %3017 = sst [smem:[#allocation31_spill]] %s2994_s2 }
   0x3   :  { %3018 = sst [smem:[#allocation32_spill]] %s2995_s3 }
   0x4   :  { %3019 = sst [smem:[#allocation33_spill]] %s2996_s4 }
   0x5   :  { %3020 = sst [smem:[#allocation34_spill]] %s2997_s5 }
   0x6   :  { %3021 = sst [smem:[#allocation35_spill]] %s2998_s6 }
   0x7   :  { %3022 = sst [smem:[#allocation36_spill]] %s2999_s7 }
   0x8   :  { %3023 = sst [smem:[#allocation37_spill]] %s3000_s8 }
   0x9   :  { %13 = vsyncpa [#allocation7], 0 }
   0xa   :  { %15 = vsyncpa [#allocation7 + $0x1], 0 }
   0xb   :  { %16 = vsyncpa [#allocation10], 0 }
   0xc   :  { %18 = vsyncpa [#allocation10 + $0x1], 0 }
   0xd   :  { %19 = vsyncpa [#allocation13], 0 }
   0xe   :  { %20 = vsyncpa [#allocation8], 0 }
   0xf   :  { %22 = vsyncpa [#allocation8 + $0x1], 0  ;;  %s2427_s27 = smov 0   ;;  %s2429_s28 = smov 0  }
  0x10   :  { %s2431_s29 = smov 0   ;;  %s2433_s30 = smov 0  }
  0x11   :  { %s2435_s9 = smov 0   ;;  %s2437_s10 = smov 0  }
  0x12   :  { %s2439_s11 = smov 0   ;;  %s2441_s12 = smov 0  }
  0x13   :  { %s2443_s13 = smov 0   ;;  %s2445_s14 = smov 0  }
  0x14   :  { %s2447_s15 = smov 0   ;;  %s2449_s16 = smov 0  }
  0x15   :  { %s2451_s17 = smov 0  }
  0x16 LB: > { %3024 = sst [smem:[#allocation21_spill]] %s2314_s30  ;;  %s2493_s18 = sadd.s32 4294967295, %s2350_s17   ;;  %s2350_s17 = sphi %s2451_s17, %s28_s17   ;;  %s2346_s16 = sphi %s2449_s16, %s3087_s16   ;;  %s2342_s15 = sphi %s2447_s15, %s3086_s15   ;;  %s2338_s14 = sphi %s2445_s14, %s3085_s14   ;;  %s2334_s13 = sphi %s2443_s13, %s3084_s13   ;;  %s2330_s12 = sphi %s2441_s12, %s3083_s12   ;;  %s2326_s11 = sphi %s2439_s11, %s3082_s11   ;;  %s2322_s10 = sphi %s2437_s10, %s3081_s10   ;;  %s2318_s9 = sphi %s2435_s9, %s3080_s9   ;;  %s2314_s30 = sphi %s2433_s30, %s3079_s30   ;;  %s2310_s29 = sphi %s2431_s29, %s3078_s29   ;;  %s2306_s28 = sphi %s2429_s28, %s3077_s28   ;;  %s2302_s27 = sphi %s2427_s27, %s3076_s27  }
  0x17   : > { %3025 = sst [smem:[#allocation22_spill]] %s2326_s11  ;;  %p1685_p0 = scmp.ge.s32.totalorder %s2350_s17, 1 }
  0x18   : > { %3026 = sst [smem:[#allocation23_spill]] %s2330_s12  ;;  %p3004_p1 = scmp.eq.s32.totalorder %s2493_s18, 0 }
  0x19   : > { %3027 = sst [smem:[#allocation24_spill]] %s2334_s13  ;;  %p262_p2 = scmp.lt.s32.totalorder %s2350_s17, 9 }
  0x1a   : > { %s2352_s20 = smov [#allocation11]   ;;  %s2353_s23 = smov [#allocation12]  }
  0x1b   : > { %p2498_p3 = pnand %p1685_p0, %p262_p2  ;;  %s274_s21 = sshll.u32 %s2352_s20, 4  ;;  %s2502_s21 = int_to_ptr.vmem [resolvable:$true] %s274_s21 }
  0x1c   : > { %s290_s24 = sshll.u32 %s2353_s23, 4  ;;  %s2354_s25 = smov [#allocation14]   ;;  %s2512_s24 = int_to_ptr.vmem [resolvable:$true] %s290_s24 }
  0x1d   : > { %s3028_s19 = scalar_select %p2498_p3, 1, 0 }
  0x1e   : > { %p1868_p4 = pneg %p2498_p3  ;;  %s2514_s26 = sshll.u32 %s2354_s25, 4  ;;  %s307_s26 = int_to_ptr.vmem [resolvable:$true] %s2514_s26 }
  0x1f   : > { %3029 = sst [smem:[#allocation25_spill]] %s3028_s19  ;;  %s3031_s2 = sld [smem:[#allocation31_spill]] }
  0x20   : > { %p2508_p5 = pnand %p1868_p4, %p3004_p1 }
  0x22   : > { %p2524_p7 = pneg %p2508_p5 }
  0x25   : > { %s2056_s20 = scalar_lea.hbm %s3031_s2, 512 }
  0x26   : > { %p2057_p6 = scmp.ne.s32.totalorder %s3031_s2, %s2056_s20  ;;  %p2063_p10 = scmp.lt.u32.totalorder %s2056_s20, %s3031_s2 }
  0x28   : > { %p2059_p8 = pnand %p2524_p7, %p2057_p6 }
  0x2a   : > { %p2060_p9 = pneg %p2059_p8 }
  0x2c   : > { %p2065_p11 = pnand %p2063_p10, %p2060_p9 }
  0x2e   : > { %2068 = shalt.err (!%p2065_p11)
}
  0x2f   : > { %s2069_s7 = scalar_lea.vmem %s2502_s21, 512  ;;  %p2077_p2 = scmp.lt.s32.totalorder %s2502_s21, %s2502_s21 }
  0x30   : > { %p2070_p12 = scmp.ne.s32.totalorder %s2502_s21, %s2069_s7  ;;  %p2078_p4 = scmp.lt.s32.totalorder %s2069_s7, %s2069_s7 }
  0x32   : > { %p2072_p13 = pnand %p2070_p12, %p2524_p7  ;;  %p2079_p6 = por %p2078_p4, %p2077_p2 }
  0x34   : > { %p2073_p0 = pneg %p2072_p13 }
  0x36   : > { %p2080_p8 = pnand %p2079_p6, %p2073_p0 }
  0x38   : > { %2083 = shalt.err (!%p2080_p8)
}
  0x39   : > { %s2355_s8 = smov 128   ;;  %s2356_s12 = smov 8  }
  0x3a   : > { %1871 = dma.hbm_to_vmem [thread:$0]  (!%p2508_p5), %s3031_s2, 512, %s2502_s21, [#allocation10], %s2355_s8, %s2355_s8, %s2356_s12  }
  0x3b   : > { %s3033_s4 = sld [smem:[#allocation33_spill]] }
  0x41   : > { %s2084_s7 = scalar_lea.hbm %s3033_s4, 512 }
  0x42   : > { %p2085_p9 = scmp.ne.s32.totalorder %s3033_s4, %s2084_s7  ;;  %p2091_p12 = scmp.lt.u32.totalorder %s2084_s7, %s3033_s4 }
  0x44   : > { %p2087_p10 = pnand %p2085_p9, %p2524_p7 }
  0x46   : > { %p2088_p11 = pneg %p2087_p10 }
  0x48   : > { %p2093_p13 = pnand %p2091_p12, %p2088_p11 }
  0x4a   : > { %2096 = shalt.err (!%p2093_p13)
}
  0x4b   : > { %s2097_s21 = scalar_lea.vmem %s2512_s24, 512  ;;  %p2105_p6 = scmp.lt.s32.totalorder %s2512_s24, %s2512_s24 }
  0x4c   : > { %p2098_p0 = scmp.ne.s32.totalorder %s2512_s24, %s2097_s21  ;;  %p2106_p8 = scmp.lt.s32.totalorder %s2097_s21, %s2097_s21 }
  0x4e   : > { %p2100_p2 = pnand %p2098_p0, %p2524_p7  ;;  %p2107_p9 = por %p2106_p8, %p2105_p6 }
  0x50   : > { %p2101_p4 = pneg %p2100_p2 }
  0x52   : > { %p2108_p10 = pnand %p2107_p9, %p2101_p4 }
  0x54   : > { %2111 = shalt.err (!%p2108_p10)
}
  0x55   : > { %1874 = dma.hbm_to_vmem [thread:$0]  (!%p2508_p5), %s3033_s4, 512, %s2512_s24, [#allocation13], %s2355_s8, %s2355_s8, %s2356_s12  }
  0x56   : > { %s3034_s6 = sld [smem:[#allocation35_spill]] }
  0x5c   : > { %s2112_s13 = scalar_lea.hbm %s3034_s6, 512 }
  0x5d   : > { %p2113_p11 = scmp.ne.s32.totalorder %s3034_s6, %s2112_s13  ;;  %p2119_p0 = scmp.lt.u32.totalorder %s2112_s13, %s3034_s6 }
  0x5f   : > { %p2115_p12 = pnand %p2113_p11, %p2524_p7 }
  0x61   : > { %p2116_p13 = pneg %p2115_p12 }
  0x63   : > { %p2121_p2 = pnand %p2119_p0, %p2116_p13 }
  0x65   : > { %2124 = shalt.err (!%p2121_p2)
}
  0x66   : > { %s2125_s21 = scalar_lea.vmem %s307_s26, 512  ;;  %p2133_p9 = scmp.lt.s32.totalorder %s307_s26, %s307_s26 }
  0x67   : > { %p2126_p4 = scmp.ne.s32.totalorder %s307_s26, %s2125_s21  ;;  %p2134_p10 = scmp.lt.s32.totalorder %s2125_s21, %s2125_s21 }
  0x69   : > { %p2128_p6 = pnand %p2126_p4, %p2524_p7  ;;  %p2135_p1 = por %p2134_p10, %p2133_p9 }
  0x6b   : > { %p2129_p8 = pneg %p2128_p6 }
  0x6d   : > { %p2136_p3 = pnand %p2135_p1, %p2129_p8 }
  0x6f   : > { %2139 = shalt.err (!%p2136_p3)
}
  0x70   : > { %1877 = dma.hbm_to_vmem [thread:$0]  (!%p2508_p5), %s3034_s6, 512, %s307_s26, [#allocation13], %s2355_s8, %s2355_s8, %s2356_s12  }
  0x71   : > { %s1684_s5 = sadd.s32 4294967294, %s2350_s17   ;;  %s40_s22 = sadd.s32 1, %s2338_s14 }
  0x72   : > { %s43_s3 = sadd.s32 1, %s2342_s15  ;;  %p41_p1 = scmp.ge.s32.totalorder %s40_s22, 2 }
  0x73   : > { %s47_s11 = sadd.s32 1, %s2346_s16  ;;  %s56_s19 = sadd.s32 1, %s2322_s10 }
  0x74   : > { %p63_p3 = scmp.ne.s32.totalorder %s2322_s10, %s2318_s9  ;;  %s3089_s22 = smov (%p41_p1, %s40_s22), 0 }
  0x75   : > { %3035 = sst [smem:[#allocation26_spill]] %s3089_s22  ;;  %s3091_s3 = smov (!%p41_p1, %s43_s3), %s2342_s15 }
  0x76   : > { %p3013_p5 = scmp.eq.s32.totalorder %s2350_s17, 0  ;;  %p69_p7 = scmp.ne.s32.totalorder %s2318_s9, %s2314_s30 }
  0x77   : > { %p45_p11 = scmp.ge.s32.totalorder %s3091_s3, 2  ;;  %s80_s26 = ssub.s32 %s2338_s14, %s3089_s22 }
  0x78   : > { %p2616_p12 = por %p3013_p5, %p63_p3  ;;  %p3037_p13 = scmp.eq.s32.totalorder %s2493_s18, 0 }
  0x79   : > { %s3093_s3 = smov (%p45_p11, %s3091_s3), 0  ;;  %s3095_s11 = smov (!%p45_p11, %s47_s11), %s2346_s16 }
  0x7a   : > { %p2625_p0 = por %p3037_p13, %p69_p7  ;;  %3039 = sst [smem:[#allocation27_spill]] %s3093_s3 }
  0x7b   : > { %s52_s13 = ssub.s32 %s2342_s15, %s3093_s3  ;;  %p249_p2 = scmp.eq.s32.totalorder %s2493_s18, 7 }
  0x7c   : > { %p49_p4 = scmp.ge.s32.totalorder %s3095_s11, 2  ;;  %p255_p6 = scmp.eq.s32.totalorder %s1684_s5, 7 }
  0x7d   : > { %p2638_p8 = por %p249_p2, %p63_p3  ;;  %p3012_p9 = scmp.lt.s32.totalorder %s2350_s17, 8 }
  0x7e   : > { %s3097_s11 = smov (%p49_p4, %s3095_s11), 0  ;;  %p2648_p10 = por %p255_p6, %p69_p7 }
  0x7f   : > { %s3040_s20 = scalar_select %p2638_p8, 1, 0 }
  0x80   : > { %s3042_s23 = scalar_select %p2648_p10, 1, 0 }
  0x81   : > { %3041 = sst [smem:[#allocation28_spill]] %s3040_s20  ;;  %s323_s25 = sand.u32 1, %s2322_s10  }
  0x82   : > { %3043 = sst [smem:[#allocation29_spill]] %s3042_s23  ;;  %s51_s7 = ssub.s32 %s2346_s16, %s3097_s11 }
  0x83   : > { %s53_s21 = sor.u32 %s52_s13, %s51_s7  ;;  %s2655_s24 = sor.u32 %s80_s26, %s51_s7 }
  0x84   : > { %p54_p1 = scmp.eq.s32.totalorder %s53_s21, 0  ;;  %s1690_s1 = sshll.u32 %s323_s25, 3 }
  0x85   : > { %s1691_s5 = sshll.u32 %s2346_s16, 1  ;;  %s327_s3 = scalar_lea.vmem [#allocation6], %s1690_s1 }
  0x86   : > { %s2660_s2 = scalar_select %p54_p1, %s2322_s10, %s56_s19  }
  0x87   : > { %s332_s4 = sadd.s32 %s2342_s15, %s1691_s5  ;;  %s336_s22 = sshll.u32 %s327_s3, 4  ;;  %s2668_s22 = int_to_ptr.vmem [resolvable:$true] %s336_s22 }
  0x88   : > { %s1692_s6 = sshll.u32 %s332_s4, 7  ;;  %p2674_p7 = pnand %p3012_p9, %p2616_p12 }
  0x89   : > { %s2666_s20 = scalar_lea.hbm %s2992_s0, %s1692_s6  ;;  %s2679_s4 = sadd.s32 %s2338_s14, %s1691_s5 }
  0x8a   : > { %s324_s3 = scalar_lea.sflag [#allocation7], %s323_s25  ;;  %s2140_s30 = scalar_lea.hbm %s2666_s20, 128 }
  0x8b   : > { %p2141_p11 = scmp.ne.s32.totalorder %s2666_s20, %s2140_s30  ;;  %p2142_p13 = pneg %p2674_p7 }
  0x8c   : > { %s2145_s8 = scalar_lea.hbm %s2992_s0, 512  ;;  %p2146_p12 = scmp.lt.u32.totalorder %s2666_s20, %s2992_s0 }
  0x8d   : > { %p2143_p2 = pnand %p2142_p13, %p2141_p11  ;;  %p2147_p6 = scmp.lt.u32.totalorder %s2145_s8, %s2140_s30 }
  0x8e   : > { %p2149_p9 = scmp.lt.u32.totalorder %s2140_s30, %s2666_s20 }
  0x8f   : > { %p2144_p4 = pneg %p2143_p2  ;;  %p2148_p1 = por %p2147_p6, %p2146_p12 }
  0x91   : > { %p2150_p5 = por %p2149_p9, %p2148_p1 }
  0x93   : > { %p2151_p3 = pnand %p2150_p5, %p2144_p4 }
  0x95   : > { %2154 = shalt.err (!%p2151_p3)
}
  0x96   : > { %s2155_s25 = scalar_lea.vmem %s2668_s22, 128  ;;  %s2357_s7 = smov [#allocation6]  }
  0x97   : > { %p2156_p11 = scmp.ne.s32.totalorder %s2668_s22, %s2155_s25  ;;  %s2160_s21 = sshll.u32 %s2357_s7, 4  ;;  %s2161_s21 = int_to_ptr.vmem [resolvable:$false] %s2160_s21 }
  0x98   : > { %s2162_s1 = scalar_lea.vmem %s2161_s21, 256  ;;  %p2163_p8 = scmp.lt.s32.totalorder %s2668_s22, %s2161_s21 }
  0x99   : > { %p2158_p2 = pnand %p2156_p11, %p2142_p13  ;;  %p2164_p12 = scmp.lt.s32.totalorder %s2162_s1, %s2155_s25 }
  0x9b   : > { %p2159_p10 = pneg %p2158_p2  ;;  %p2165_p6 = por %p2164_p12, %p2163_p8 }
  0x9d   : > { %p2166_p9 = pnand %p2165_p6, %p2159_p10 }
  0x9f   : > { %2169 = shalt.err (!%p2166_p9)
}
  0xa0   : > { %1881 = dma.hbm_to_vmem [thread:$0]  (!%p2674_p7), %s2666_s20, 128, %s2668_s22, %s324_s3  }
  0xa1   : > { %s84_s5 = sadd.s32 1, %s2310_s29  ;;  %p3045_p5 = scmp.eq.s32.totalorder %s2655_s24, 0 }
  0xa2   : > { %p91_p8 = scmp.ne.s32.totalorder %s2310_s29, %s2306_s28  ;;  %p97_p10 = scmp.ne.s32.totalorder %s2306_s28, %s2302_s27 }
  0xa3   : > { %s2710_s30 = scalar_select %p3045_p5, %s2310_s29, %s84_s5  }
  0xa4   : > { %s343_s19 = sand.u32 1, %s2350_s17   ;;  %s345_s6 = sand.u32 1, %s2310_s29  }
  0xa5   : > { %p3046_p3 = scmp.eq.s32.totalorder %s2350_s17, 0  ;;  %p3047_p4 = scmp.eq.s32.totalorder %s2493_s18, 0 }
  0xa6   : > { %s1693_s8 = sshll.u32 %s345_s6, 3  ;;  %s1695_s13 = sshll.u32 %s2679_s4, 7 }
  0xa7   : > { %p93_p13 = por %p91_p8, %p3046_p3  ;;  %p2722_p1 = por %p97_p10, %p3047_p4 }
  0xa8   : > { %s3049_s22 = sld [smem:[#allocation30_spill]]  ;;  %s347_s27 = scalar_lea.vmem [#allocation9], %s1693_s8 }
  0xa9   : > { %s3048_s26 = scalar_select %p2722_p1, 1, 0 }
  0xaa   : > { %s356_s24 = sshll.u32 %s347_s27, 4  ;;  %p3050_p7 = scmp.lt.s32.totalorder %s2350_s17, 8  ;;  %s2732_s24 = int_to_ptr.vmem [resolvable:$true] %s356_s24 }
  0xab   : > { %s344_s4 = scalar_lea.sflag [#allocation10], %s343_s19 }
  0xac   : > { %p2736_p11 = pnand %p3050_p7, %p93_p13 }
  0xae   : > { %s2730_s20 = scalar_lea.hbm %s3049_s22, %s1695_s13  ;;  %p2172_p12 = pneg %p2736_p11 }
  0xaf   : > { %s2170_s7 = scalar_lea.hbm %s2730_s20, 128  ;;  %s2175_s5 = scalar_lea.hbm %s3049_s22, 512 }
  0xb0   : > { %p2171_p2 = scmp.ne.s32.totalorder %s2730_s20, %s2170_s7  ;;  %p2176_p5 = scmp.lt.u32.totalorder %s2730_s20, %s3049_s22 }
  0xb1   : > { %p2177_p8 = scmp.lt.u32.totalorder %s2175_s5, %s2170_s7  ;;  %p2179_p3 = scmp.lt.u32.totalorder %s2170_s7, %s2730_s20 }
  0xb2   : > { %p2173_p6 = pnand %p2172_p12, %p2171_p2 }
  0xb3   : > { %p2178_p10 = por %p2177_p8, %p2176_p5 }
  0xb4   : > { %p2174_p9 = pneg %p2173_p6 }
  0xb5   : > { %p2180_p13 = por %p2179_p3, %p2178_p10 }
  0xb7   : > { %p2181_p4 = pnand %p2180_p13, %p2174_p9 }
  0xb9   : > { %2184 = shalt.err (!%p2181_p4)
}
  0xba   : > { %s2185_s19 = scalar_lea.vmem %s2732_s24, 128  ;;  %s2358_s13 = smov [#allocation9]  }
  0xbb   : > { %p2186_p7 = scmp.ne.s32.totalorder %s2732_s24, %s2185_s19  ;;  %s2190_s23 = sshll.u32 %s2358_s13, 4  ;;  %s2191_s23 = int_to_ptr.vmem [resolvable:$false] %s2190_s23 }
  0xbc   : > { %s2192_s25 = scalar_lea.vmem %s2191_s23, 256  ;;  %p2193_p1 = scmp.lt.s32.totalorder %s2732_s24, %s2191_s23 }
  0xbd   : > { %p2188_p2 = pnand %p2186_p7, %p2172_p12  ;;  %p2194_p5 = scmp.lt.s32.totalorder %s2192_s25, %s2185_s19 }
  0xbf   : > { %p2189_p6 = pneg %p2188_p2  ;;  %p2195_p8 = por %p2194_p5, %p2193_p1 }
  0xc1   : > { %p2196_p10 = pnand %p2195_p8, %p2189_p6 }
  0xc3   : > { %2199 = shalt.err (!%p2196_p10)
}
  0xc4   : > { %1884 = dma.hbm_to_vmem [thread:$0]  (!%p2736_p11), %s2730_s20, 128, %s2732_s24, %s344_s4  }
  0xc5   : > { %s3052_s27 = sld [smem:[#allocation25_spill]] }
  0xcb   : > { %p3053_p9 = scmp.ne.s32.totalorder %s3052_s27, 0 }
  0xcc   : > { %s2768_s7 = sand.u32 (!%p3053_p9), 1, %s2318_s9  }
  0xcd   : > { %365 = sbr.rel (%p3053_p9) target bundleno = 2093 (0x82d), region = 52  ;;  %s1697_s21 = sshll.u32 (!%p3053_p9), %s2768_s7, 3 }
  0xce   : > { %s368_s1 = scalar_lea.sflag (!%p3053_p9), [#allocation7], %s2768_s7  ;;  %s2772_s5 = scalar_lea.vmem (!%p3053_p9), [#allocation6], %s1697_s21 }
  0xd4   : > { %2281 = dma.done.wait (%p2625_p0), %s368_s1, 128  }
  0xd5   : > { %2283 = vsyncadd (%p2625_p0), %s368_s1, 4294967168  ;;  %s376_s20 = sand.u32 1, %s2493_s18   ;;  %s378_s24 = sand.u32 1, %s2306_s28  }
  0xd6   : > { %s2780_s3 = sshll.u32 %s378_s24, 3  ;;  %s377_s4 = scalar_lea.sflag [#allocation10], %s376_s20 }
  0xd7   : > { %s380_s6 = scalar_lea.vmem [#allocation9], %s2780_s3  ;;  %p3054_p1 = scmp.ne.s32.totalorder %s3048_s26, 0 }
  0xd9   : > { %2285 = dma.done.wait (%p3054_p1), %s377_s4, 128  }
  0xda   : > { %2287 = vsyncadd (%p3054_p1), %s377_s4, 4294967168  ;;  %p3055_p11 = scmp.eq.s32.totalorder %s2493_s18, 0 }
  0xdc   : > { %2289 = dma.done.wait (%p3055_p11), [#allocation10], 512   ;;  %p3056_p0 = pmov %p3055_p11 }
  0xde   : > { %2291 = vsyncadd (%p3056_p0), [#allocation10], 4294966784  ;;  %p3057_p12 = pmov %p3056_p0 }
  0xdf   : > { %p3058_p3 = pmov %p3056_p0 }
  0xe0   : > { %2293 = dma.done.wait (%p3057_p12), [#allocation13], 1024  }
  0xe1   : > { %2295 = vsyncadd (%p3058_p3), [#allocation13], 4294966272  ;;  %s2795_s12 = scalar_lea.vmem [#allocation15], %s1697_s21  ;;  %s3059_s8 = sld [smem:[#allocation22_spill]] }
  0xe7   : > { %p1703_p13 = scmp.ne.s32.totalorder %s3059_s8, 0 }
  0xe8   : > { %v435_v0 = vld [vmem:[#allocation11] sm:$0xff] (!%p1703_p13)  ;;  %v436_v1 = vld [vmem:[#allocation11 + $0x8] sm:$0xff] (!%p1703_p13)  ;;  %v437_v2 = vld [vmem:[#allocation11 + $0x10] sm:$0xff] (!%p1703_p13)  ;;  %v2359_v3 = vmov (!%p1703_p13), 0.0|0.0   ;;  %vm2360_vm0 = vmmov (!%p1703_p13), 0   ;;  %v2361_v6 = vmov (!%p1703_p13), 0.0  }
  0xe9   : > { %433 = sbr.rel (%p1703_p13) target bundleno = 457 (0x1c9), region = 76  ;;  %1832 = vmatprep.subr.bf16.mxu0 (!%p1703_p13), %v2359_v3  ;;  %v1833_v4 = vpack.c.bf16 (!%p1703_p13), %v436_v1, %v435_v0  ;;  %v438_v5 = vld [vmem:[#allocation11 + $0x18] sm:$0xff] (!%p1703_p13)  ;;  %1767 = vmatprep.mubr.msk.f32.mxu0 (!%p1703_p13), %vm2360_vm0, %v2361_v6  ;;  %vm521_vm1 = vcmask (!%p1703_p13), 7168   ;;  %vm446_vm2 = vcmask (!%p1703_p13), 261120   ;;  %v2362_v7 = vmov (!%p1703_p13), -inf   ;;  %v434_v9 = vld [vmem:[%s2772_s5] sm:$0xff] (!%p1703_p13) }
  0xea   : > { %522 = vst.msk [vmem:[#allocation3] sm:$0xff] (!%p1703_p13), %vm521_vm1, %v2362_v7  ;;  %523 = vst.msk [vmem:[#allocation3 + $0x8] sm:$0xff] (!%p1703_p13), %vm521_vm1, %v2362_v7  ;;  %v1836_v8 = vpack.c.bf16 (!%p1703_p13), %v438_v5, %v437_v2  ;;  %s3060_s19 = sld [smem:[#allocation32_spill]] (!%p1703_p13) }
  0xeb   : > { %524 = vst.msk [vmem:[#allocation3 + $0x10] sm:$0xff] (!%p1703_p13), %vm521_vm1, %v2362_v7  ;;  %525 = vst.msk [vmem:[#allocation3 + $0x18] sm:$0xff] (!%p1703_p13), %vm521_vm1, %v2362_v7  ;;  %1834 = vmatpush3.bf16.msra.mxu0 (!%p1703_p13), %v1833_v4 }
  0xec   : > { %526 = vst.msk [vmem:[#allocation4] sm:$0xff] (!%p1703_p13), %vm521_vm1, %v2361_v6  ;;  %527 = vst.msk [vmem:[#allocation4 + $0x8] sm:$0xff] (!%p1703_p13), %vm521_vm1, %v2361_v6  ;;  %1835 = vmatprep.subr.bf16.mxu0 (!%p1703_p13), %v2359_v3 }
  0xed   : > { %528 = vst.msk [vmem:[#allocation4 + $0x10] sm:$0xff] (!%p1703_p13), %vm521_vm1, %v2361_v6  ;;  %529 = vst.msk [vmem:[#allocation4 + $0x18] sm:$0xff] (!%p1703_p13), %vm521_vm1, %v2361_v6 }
  0xee   : > { %530 = vst.msk [vmem:[#allocation5] sm:$0xff] (!%p1703_p13), %vm446_vm2, %v2361_v6 }
  0xef   : > { %1837 = vmatpush3.bf16.msra.mxu0 (!%p1703_p13), %v1836_v8 }
  0xf0   : > { %v1704_v10 = vld [vmem:[%s3060_s19] ss:$0 sm:$0xff] }
  0xf2   : > { %1768 = vmatmul.mubr.msk.f32.vlgmr.msra.gmra.mrb[0].mxu0 %vm446_vm2, %v434_v9 }
 0x1c5   : > { %v516_v11 = vpop.f32.mrb[0].mxu0 }
 0x1c6   : > { %v517_v12 = vadd.f32 %v1704_v10, %v516_v11  ;;  %v1769_v13 = vpop.f32.mrb[1].mxu0 }
 0x1c8   : > { %520 = vst.msk [vmem:[#allocation2] sm:$0xff] %vm446_vm2, %v517_v12 }
 0x1c9 PF: > { %v532_v14 = vld [vmem:[#allocation12] sm:$0xff]  ;;  %v533_v15 = vld [vmem:[#allocation12 + $0x8] sm:$0xff]  ;;  %v534_v16 = vld [vmem:[#allocation12 + $0x10] sm:$0xff]  ;;  %v2363_v17 = vmov 0.0|0.0   ;;  %vm2364_vm3 = vmmov 0   ;;  %v2365_v20 = vmov 0.0  }
 0x1ca   : > { %1838 = vmatprep.subr.bf16.mxu0 %v2363_v17  ;;  %v1839_v18 = vpack.c.bf16 %v533_v15, %v532_v14  ;;  %v535_v19 = vld [vmem:[#allocation12 + $0x18] sm:$0xff]  ;;  %1778 = vmatprep.mubr.msk.f32.mxu0 %vm2364_vm3, %v2365_v20  ;;  %vm543_vm4 = vcmask 261120   ;;  %s3061_s25 = sld [smem:[#allocation34_spill]]  ;;  %vm618_vm5 = vcmask 64512   ;;  %s2366_s27 = smov 112   ;;  %v2369_v37 = vmov 0  }
 0x1cb   : > { %1781 = vmatprep.subr.mxu1 %v2365_v20  ;;  %1783 = vmatprep.mubr.msk.f32.mxu1 %vm2364_vm3, %v2365_v20  ;;  %v1842_v21 = vpack.c.bf16 %v535_v19, %v534_v16  ;;  %v531_v22 = vld [vmem:[%s380_s6] sm:$0xff]  ;;  %s2367_s21 = smov 120   ;;  %s2368_s1 = smov 104   ;;  %vm717_vm6 = vcmask 7168   ;;  %v886_v52 = vld [vmem:[#allocation3 + $0x8] sm:$0xff]  ;;  %v1082_v55 = vld [vmem:[#allocation3 + $0x10] sm:$0xff] }
 0x1cc   : > { %1840 = vmatpush3.bf16.msra.mxu0 %v1839_v18  ;;  %2028 = vset.pattern.permute.xlu1 %v2369_v37  ;;  %v695_v47 = vld [vmem:[#allocation3] sm:$0xff]  ;;  %v2862_v59 = vld [vmem:[#allocation3 + $0x18] sm:$0xff]  ;;  %s2370_s5 = smov 96   ;;  %s2371_s20 = smov 88   ;;  %vm998_vm7 = vcmask 130112   ;;  %vm1194_vm8 = vcmask 195712  }
 0x1cd   : > { %1841 = vmatprep.subr.bf16.mxu0 %v2363_v17  ;;  %2029 = vset.pattern.permute.xlu0 %v2369_v37  ;;  %s2372_s24 = smov 80   ;;  %s2373_s3 = smov 72   ;;  %vm1390_vm9 = vcmask 261312  }
 0x1ce   : > { %s2374_s4 = smov 8   ;;  %s2375_s6 = smov 16  }
 0x1cf   : > { %v617_v27 = vld [vmem:[#allocation2] sm:$0xff]  ;;  %s2376_s8 = smov 24   ;;  %s3062_s18 = sld [smem:[#allocation22_spill]] }
 0x1d0   : > { %1843 = vmatpush3.bf16.msra.mxu0 %v1842_v21  ;;  %v1706_v23 = vld [vmem:[%s3061_s25] ss:$0 sm:$0xff] }
 0x1d1   : > { %1791 = vmatprep.subr.mxu0 %v2365_v20 }
 0x1d3   : > { %1779 = vmatmul.mubr.msk.f32.vlgmr.msra.gmra.mrb[0].mxu0 %vm543_vm4, %v531_v22 }
 0x1d4   : > { %1793 = vmatprep.mubr.msk.f32.mxu0 %vm2364_vm3, %v2365_v20 }
 0x1d5   : > { %p1720_p4 = scmp.ne.s32.totalorder %s3062_s18, 1 }
 0x1d6   : > { %vm2379_vm10 = vmmov (!%p1720_p4), 0   ;;  %s3063_s13 = sld [smem:[#allocation36_spill]] (!%p1720_p4) }
 0x2a6   : > { %v613_v24 = vpop.f32.mrb[0].mxu0 }
 0x2a7   : > { %v2819_v25 = vadd.f32 %v1706_v23, %v613_v24  ;;  %v1780_v26 = vpop.f32.mrb[1].mxu0 }
 0x2a9   : > { %1005 = vrot.lane.b32.xlu1 %v2819_v25, %s2366_s27  ;;  %809 = vrot.lane.b32.xlu0 %v2819_v25, %s2367_s21 }
 0x2aa   : > { %1782 = vmatpush3.xpose.msk.msra.mxu1 %vm618_vm5, %v2819_v25 }
 0x2ab   : > { %1786 = vmatprep.subr.mxu1 %v2365_v20 }
 0x2ad   : > { %1784 = vmatmul.mubr.msk.f32.vlgmr.msra.gmra.mrb[0].mxu1 %vm618_vm5, %v617_v27  ;;  %807 = vrot.lane.b32.xlu0 %v617_v27, %s2367_s21 }
 0x2ae   : > { %1003 = vrot.lane.b32.xlu1 %v617_v27, %s2366_s27  ;;  %1788 = vmatprep.mubr.msk.f32.mxu1 %vm2364_vm3, %v2365_v20 }
 0x2b1   : > { %1201 = vrot.lane.b32.xlu0 %v2819_v25, %s2368_s1 }
 0x2b2   : > { %1199 = vrot.lane.b32.xlu1 %v617_v27, %s2368_s1 }
 0x31b   : > { %v810_v28 = vpop.permute.xlu0 %809  ;;  %v1006_v29 = vpop.permute.xlu1 %1005 }
 0x31c   : > { %1792 = vmatpush3.xpose.msk.msra.mxu0 %vm618_vm5, %v810_v28 }
 0x31d   : > { %1801 = vmatprep.subr.mxu0 %v2365_v20 }
 0x31f   : > { %v808_v30 = vpop.permute.xlu0 %807 }
 0x320   : > { %1794 = vmatmul.mubr.msk.f32.vlgmr.msra.gmra.mrb[2].mxu0 %vm618_vm5, %v808_v30  ;;  %v1004_v31 = vpop.permute.xlu1 %1003 }
 0x321   : > { %1802 = vmatpush3.xpose.msk.msra.mxu0 %vm618_vm5, %v1006_v29  ;;  %1803 = vmatprep.mubr.msk.f32.mxu0 %vm2364_vm3, %v2365_v20 }
 0x322   : > { %1811 = vmatprep.subr.mxu0 %v2365_v20 }
 0x323   : > { %v1202_v32 = vpop.permute.xlu0 %1201 }
 0x324   : > { %1804 = vmatmul.mubr.msk.f32.vlgmr.msra.gmra.mrb[4].mxu0 %vm618_vm5, %v1004_v31  ;;  %v1200_v33 = vpop.permute.xlu1 %1199 }
 0x325   : > { %1812 = vmatpush3.xpose.msk.msra.mxu0 %vm618_vm5, %v1202_v32  ;;  %1813 = vmatprep.mubr.msk.f32.mxu0 %vm2364_vm3, %v2365_v20  ;;  %v711_v32 = vld [vmem:[#allocation4] sm:$0xff] }
 0x328   : > { %1814 = vmatmul.mubr.msk.f32.vlgmr.msra.gmra.mrb[6].mxu0 %vm618_vm5, %v1200_v33 }
 0x380   : > { %v2842_v34 = vpop.f32.mrb[0].mxu1 }
 0x381   : > { %v696_v35 = vsel %vm618_vm5, %v2842_v34, -inf  ;;  %v1785_v36 = vpop.f32.mrb[1].mxu1 }
 0x382   : > { %697 = vmax.xlane.f32.xlu0 %v696_v35 }
 0x3f3   : > { %v2846_v38 = vpop.f32.mrb[2].mxu0 }
 0x3f4   : > { %v1795_v39 = vpop.f32.mrb[3].mxu0  ;;  %v887_v40 = vsel %vm618_vm5, %v2846_v38, -inf }
 0x3f5   : > { %888 = vmax.xlane.f32.xlu1 %v887_v40  ;;  %v1099_v40 = vld [vmem:[#allocation4 + $0x10] sm:$0xff] }
 0x3f7   : > { %v2850_v41 = vpop.f32.mrb[4].mxu0 }
 0x3f8   : > { %v1805_v42 = vpop.f32.mrb[5].mxu0  ;;  %v1083_v43 = vsel %vm618_vm5, %v2850_v41, -inf }
 0x3f9   : > { %1084 = vmax.xlane.f32.xlu0 %v1083_v43 }
 0x3fb   : > { %v2854_v44 = vpop.f32.mrb[6].mxu0 }
 0x3fc   : > { %v1815_v45 = vpop.f32.mrb[7].mxu0  ;;  %v1279_v46 = vsel %vm618_vm5, %v2854_v44, -inf }
 0x3fd   : > { %1280 = vmax.xlane.f32.xlu0 %v1279_v46  ;;  %v719_v45 = vld [vmem:[#allocation5] sm:$0xff] }
 0x40f   : > { %v698_v48 = vpop.xlane.xlu0 %697 }
 0x410   : > { %v699_v49 = vmax.f32 %v695_v47, %v698_v48 }
 0x412   : > { %v700_v50 = vsub.f32 %v695_v47, %v699_v49  ;;  %804 = vst.msk [vmem:[#allocation3] sm:$0xff] %vm717_vm6, %v699_v49  ;;  %705 = vperm.xlu1 %2028, %v699_v49  }
 0x414   : > { %v701_v51 = vmul.f32 1.442695, %v700_v50 }
 0x416   : > { %2030 = vpow2.f32 %v701_v51 }
 0x420   : > { %v2860_v56 = vpop.eup %2030 }
 0x421   : > { %v712_v33 = vmul.f32 %v2860_v56, %v711_v32 }
 0x482   : > { %v889_v53 = vpop.xlane.xlu1 %888 }
 0x483   : > { %v890_v54 = vmax.f32 %v886_v52, %v889_v53 }
 0x485   : > { %1000 = vst.msk [vmem:[#allocation3 + $0x8] sm:$0xff] %vm717_vm6, %v890_v54  ;;  %896 = vperm.xlu0 %2029, %v890_v54   ;;  %v891_v1 = vsub.f32 %v886_v52, %v890_v54 }
 0x486   : > { %v1085_v57 = vpop.xlane.xlu0 %1084 }
 0x487   : > { %v1086_v58 = vmax.f32 %v1082_v55, %v1085_v57  ;;  %v892_v2 = vmul.f32 1.442695, %v891_v1  ;;  %v1295_v1 = vld [vmem:[#allocation4 + $0x18] sm:$0xff] }
 0x489   : > { %v1087_v60 = vsub.f32 %v1082_v55, %v1086_v58  ;;  %1196 = vst.msk [vmem:[#allocation3 + $0x10] sm:$0xff] %vm717_vm6, %v1086_v58  ;;  %1092 = vperm.xlu1 %2028, %v1086_v58   ;;  %722 = vperm.xlu0 %2029, %v2860_v56  }
 0x48a   : > { %v1281_v61 = vpop.xlane.xlu0 %1280 }
 0x48b   : > { %v1088_v62 = vmul.f32 1.442695, %v1087_v60  ;;  %v1282_v63 = vmax.f32 %v2862_v59, %v1281_v61 }
 0x48d   : > { %2032 = vpow2.f32 %v1088_v62  ;;  %726 = vrot.lane.b32.xlu1 %v2819_v25, %s2370_s5  ;;  %v1283_v0 = vsub.f32 %v2862_v59, %v1282_v63  ;;  %1392 = vst.msk [vmem:[#allocation3 + $0x18] sm:$0xff] %vm717_vm6, %v1282_v63 }
 0x48e   : > { %2034 = vpow2.f32 %v892_v2 }
 0x48f   : > { %v1284_v27 = vmul.f32 1.442695, %v1283_v0 }
 0x491   : > { %917 = vrot.lane.b32.xlu1 %v2819_v25, %s2371_s20  ;;  %v706_v5 = vpop.permute.xlu1 %705 }
 0x492   : > { %v708_v6 = vsub.f32 %v2842_v34, %v706_v5 }
 0x494   : > { %v709_v7 = vmul.f32 1.442695, %v708_v6 }
 0x495   : > { %1288 = vperm.xlu1 %2028, %v1282_v63  }
 0x496   : > { %2036 = vpow2.f32 %v709_v7 }
 0x497   : > { %v2871_v3 = vpop.eup %2032 }
 0x498   : > { %1109 = vperm.xlu0 %2029, %v2871_v3   ;;  %v2035_v4 = vpop.eup %2034  ;;  %v1100_v42 = vmul.f32 %v2871_v3, %v1099_v40  ;;  %v1721_v40 = vld [vmem:[%s3063_s13] ss:$0 sm:$0xff] (!%p1720_p4) }
 0x499   : > { %1113 = vrot.lane.b32.xlu1 %v2819_v25, %s2372_s24 }
 0x49d   : > { %1309 = vrot.lane.b32.xlu1 %v2819_v25, %s2373_s3 }
 0x4a0   : > { %v2037_v8 = vpop.eup %2036 }
 0x4a1   : > { %913 = vperm.xlu1 %2028, %v2035_v4   ;;  %v713_v9 = vsel %vm618_vm5, %v2037_v8, 0.0 }
 0x4c5   : > { %714 = vadd.xlane.f32.xlu1 %v713_v9 }
 0x504   : > { %v897_v10 = vpop.permute.xlu0 %896 }
 0x505   : > { %v899_v11 = vsub.f32 %v2846_v38, %v897_v10  ;;  %v903_v38 = vld [vmem:[#allocation4 + $0x8] sm:$0xff] }
 0x507   : > { %v900_v12 = vmul.f32 1.442695, %v899_v11 }
 0x508   : > { %v1093_v13 = vpop.permute.xlu1 %1092  ;;  %v723_v36 = vpop.permute.xlu0 %722 }
 0x509   : > { %2038 = vpow2.f32 %v900_v12  ;;  %v1095_v14 = vsub.f32 %v2850_v41, %v1093_v13  ;;  %v725_v46 = vmul.f32 %v723_v36, %v719_v45  ;;  %v2377_v13 = vmov (!%p1720_p4), 0  }
 0x50a   : > { %2046 = vset.pattern.permute.xlu0 (!%p1720_p4), %v2377_v13 }
 0x50b   : > { %v1096_v15 = vmul.f32 1.442695, %v1095_v14 }
 0x50c   : > { %v727_v16 = vpop.permute.xlu1 %726 }
 0x50d   : > { %2040 = vpow2.f32 %v1096_v15  ;;  %1787 = vmatpush3.msra.mxu1 %v727_v16 }
 0x50e   : > { %1789 = vmatmul.mubr.msk.f32.vlgmr.msra.gmra.mrb[2].mxu1 %vm618_vm5, %v2037_v8  ;;  %1796 = vmatprep.subr.mxu1 %v2365_v20 }
 0x50f   : > { %1798 = vmatprep.mubr.msk.f32.mxu1 %vm2364_vm3, %v2365_v20 }
 0x510   : > { %v918_v17 = vpop.permute.xlu1 %917 }
 0x511   : > { %1797 = vmatpush3.msra.mxu1 %v918_v17 }
 0x512   : > { %1806 = vmatprep.subr.mxu1 %v2365_v20 }
 0x513   : > { %v2039_v18 = vpop.eup %2038 }
 0x514   : > { %v1289_v19 = vpop.permute.xlu1 %1288  ;;  %1799 = vmatmul.mubr.msk.f32.vlgmr.msra.gmra.mrb[4].mxu1 %vm618_vm5, %v2039_v18  ;;  %v905_v21 = vsel %vm618_vm5, %v2039_v18, 0.0 }
 0x515   : > { %v1291_v22 = vsub.f32 %v2854_v44, %v1289_v19  ;;  %906 = vadd.xlane.f32.xlu0 %v905_v21  ;;  %1808 = vmatprep.mubr.msk.f32.mxu1 %vm2364_vm3, %v2365_v20  ;;  %v1438_v19 = vld [vmem:[#allocation14] sm:$0xff] (!%p1720_p4)  ;;  %v1439_v21 = vld [vmem:[#allocation14 + $0x8] sm:$0xff] (!%p1720_p4) }
 0x517   : > { %v2041_v23 = vpop.eup %2040  ;;  %v1292_v24 = vmul.f32 1.442695, %v1291_v22  ;;  %v1110_v37 = vpop.permute.xlu0 %1109  ;;  %v1845_v22 = vpack.c.bf16 (!%p1720_p4), %v1439_v21, %v1438_v19 }
 0x518   : > { %v1114_v25 = vpop.permute.xlu1 %1113  ;;  %v1101_v26 = vsel %vm618_vm5, %v2041_v23, 0.0 }
 0x519   : > { %2042 = vpow2.f32 %v1292_v24  ;;  %1102 = vadd.xlane.f32.xlu1 %v1101_v26  ;;  %1807 = vmatpush3.msra.mxu1 %v1114_v25  ;;  %v1440_v24 = vld [vmem:[#allocation14 + $0x10] sm:$0xff] (!%p1720_p4)  ;;  %v1441_v25 = vld [vmem:[#allocation14 + $0x18] sm:$0xff] (!%p1720_p4) }
 0x51a   : > { %1809 = vmatmul.mubr.msk.f32.vlgmr.msra.gmra.mrb[6].mxu1 %vm618_vm5, %v2041_v23  ;;  %1816 = vmatprep.subr.mxu1 %v2365_v20  ;;  %2044 = vpow2.f32 %v1284_v27  ;;  %v2378_v23 = vmov (!%p1720_p4), 0.0|0.0   ;;  %v1848_v26 = vpack.c.bf16 (!%p1720_p4), %v1441_v25, %v1440_v24  ;;  %v2380_v27 = vmov (!%p1720_p4), 0.0  }
 0x51b   : > { %1818 = vmatprep.mubr.msk.f32.mxu1 %vm2364_vm3, %v2365_v20  ;;  %v904_v20 = vmul.f32 %v2035_v4, %v903_v38  ;;  %1844 = vmatprep.subr.bf16.mxu0 (!%p1720_p4), %v2378_v23 }
 0x51c   : > { %v1310_v28 = vpop.permute.xlu1 %1309  ;;  %1846 = vmatpush3.bf16.msra.mxu0 (!%p1720_p4), %v1845_v22  ;;  %1829 = vmatprep.mubr.msk.f32.mxu0 (!%p1720_p4), %vm2379_vm10, %v2380_v27 }
 0x51d   : > { %1817 = vmatpush3.msra.mxu1 %v1310_v28  ;;  %1847 = vmatprep.subr.bf16.mxu0 (!%p1720_p4), %v2378_v23 }
 0x520   : > { %v914_v31 = vpop.permute.xlu1 %913  ;;  %1849 = vmatpush3.bf16.msra.mxu0 (!%p1720_p4), %v1848_v26 }
 0x523   : > { %v2043_v29 = vpop.eup %2042 }
 0x524   : > { %1819 = vmatmul.mubr.msk.f32.vlgmr.msra.gmra.mrb[8].mxu1 %vm618_vm5, %v2043_v29  ;;  %v2045_v30 = vpop.eup %2044  ;;  %v1297_v56 = vsel %vm618_vm5, %v2043_v29, 0.0 }
 0x525   : > { %v1296_v2 = vmul.f32 %v2045_v30, %v1295_v1 }
 0x52a   : > { %1305 = vperm.xlu1 %2028, %v2045_v30  }
 0x52e   : > { %2047 = vset.pattern.permute.xlu1 (!%p1720_p4), %v2377_v13 }
 0x552   : > { %v715_v34 = vpop.xlane.xlu1 %714 }
 0x553   : > { %v716_v35 = vadd.f32 %v715_v34, %v712_v33 }
 0x555   : > { %718 = vst.msk [vmem:[#allocation4] sm:$0xff] %vm717_vm6, %v716_v35 }
 0x55c   : > { %v1397_v10 = vld [vmem:[#allocation4] sm:$0xff] (!%p1720_p4) }
 0x55d   : > { %2048 = vrcp.f32 (!%p1720_p4), %v1397_v10 }
 0x567   : > { %v2049_v15 = vpop.eup (!%p1720_p4), %2048 }
 0x5a2   : > { %v907_v39 = vpop.xlane.xlu0 %906 }
 0x5a3   : > { %v908_v41 = vadd.f32 %v907_v39, %v904_v20 }
 0x5a5   : > { %909 = vst.msk [vmem:[#allocation4 + $0x8] sm:$0xff] %vm717_vm6, %v908_v41 }
 0x5a6   : > { %v1103_v43 = vpop.xlane.xlu1 %1102 }
 0x5a7   : > { %v1104_v44 = vadd.f32 %v1103_v43, %v1100_v42 }
 0x5a9   : > { %1105 = vst.msk [vmem:[#allocation4 + $0x10] sm:$0xff] %vm717_vm6, %v1104_v44 }
 0x5aa   : > { %v1306_v6 = vpop.permute.xlu1 %1305 }
 0x5ac   : > { %v1407_v11 = vld [vmem:[#allocation4 + $0x8] sm:$0xff] (!%p1720_p4) }
 0x5ad   : > { %2050 = vrcp.f32 (!%p1720_p4), %v1407_v11 }
 0x5b0   : > { %v1417_v12 = vld [vmem:[#allocation4 + $0x10] sm:$0xff] (!%p1720_p4) }
 0x5b1   : > { %2052 = vrcp.f32 (!%p1720_p4), %v1417_v12 }
 0x5b7   : > { %v2051_v16 = vpop.eup (!%p1720_p4), %2050 }
 0x5bb   : > { %v2053_v17 = vpop.eup (!%p1720_p4), %2052 }
 0x5bc   : > { %1422 = vperm.xlu1 (!%p1720_p4), %2047, %v2053_v17  }
 0x5e1   : > { %v798_v47 = vpop.f32.mrb[2].mxu1 }
 0x5e2   : > { %v802_v48 = vadd.f32 %v798_v47, %v725_v46  ;;  %v1790_v49 = vpop.f32.mrb[3].mxu1 }
 0x5e4   : > { %803 = vst.msk [vmem:[#allocation5] sm:$0xff] %vm618_vm5, %v802_v48 }
 0x5e7   : > { %v989_v50 = vpop.f32.mrb[4].mxu1 }
 0x5e8   : > { %v1800_v51 = vpop.f32.mrb[5].mxu1  ;;  %994 = vrot.lane.b32.xlu0 %v989_v50, %s2374_s4 }
 0x5eb   : > { %v910_v57 = vld [vmem:[#allocation5] sm:$0xff] }
 0x5ec   : > { %v916_v58 = vmul.f32 %v914_v31, %v910_v57 }
 0x5ed   : > { %v1185_v52 = vpop.f32.mrb[6].mxu1 }
 0x5ee   : > { %v1810_v53 = vpop.f32.mrb[7].mxu1  ;;  %1190 = vrot.lane.b32.xlu0 %v1185_v52, %s2375_s6 }
 0x5f7   : > { %v1381_v54 = vpop.f32.mrb[8].mxu1 }
 0x5f8   : > { %v1820_v55 = vpop.f32.mrb[9].mxu1 }
 0x60d   : > { %1298 = vadd.xlane.f32.xlu0 %v1297_v56 }
 0x623   : > { %1386 = vrot.lane.b32.xlu0 %v1381_v54, %s2376_s8 }
 0x627   : > { %1402 = vperm.xlu0 (!%p1720_p4), %2046, %v2049_v15  }
 0x62b   : > { %1412 = vperm.xlu0 (!%p1720_p4), %2046, %v2051_v16  }
 0x63b   : > { %v1423_v34 = vpop.permute.xlu1 (!%p1720_p4), %1422 }
 0x65a   : > { %v995_v59 = vpop.permute.xlu0 %994 }
 0x65b   : > { %v997_v60 = vadd.f32 %v995_v59, %v916_v58 }
 0x65d   : > { %999 = vst.msk [vmem:[#allocation5] sm:$0xff] %vm998_vm7, %v997_v60 }
 0x660   : > { %v1191_v63 = vpop.permute.xlu0 %1190 }
 0x664   : > { %v1106_v61 = vld [vmem:[#allocation5] sm:$0xff] }
 0x665   : > { %v1112_v62 = vmul.f32 %v1110_v37, %v1106_v61 }
 0x667   : > { %v1193_v0 = vadd.f32 %v1191_v63, %v1112_v62 }
 0x669   : > { %1195 = vst.msk [vmem:[#allocation5] sm:$0xff] %vm1194_vm8, %v1193_v0 }
 0x670   : > { %v1302_v4 = vld [vmem:[#allocation5] sm:$0xff] }
 0x671   : > { %v1308_v7 = vmul.f32 %v1306_v6, %v1302_v4 }
 0x69a   : > { %v1299_v3 = vpop.xlane.xlu0 %1298 }
 0x69b   : > { %v1300_v5 = vadd.f32 %v1299_v3, %v1296_v2  ;;  %1396 = sbr.rel (%p1720_p4) target bundleno = 2065 (0x811), region = 80 }
 0x69d   : > { %1301 = vst.msk [vmem:[#allocation4 + $0x18] sm:$0xff] %vm717_vm6, %v1300_v5 }
 0x69e   : > { %v1387_v8 = vpop.permute.xlu0 %1386 }
 0x69f   : > { %v1389_v9 = vadd.f32 %v1387_v8, %v1308_v7 }
 0x6a1   : > { %1391 = vst.msk [vmem:[#allocation5] sm:$0xff] %vm1390_vm9, %v1389_v9 }
 0x6a4   : > { %v1427_v14 = vld [vmem:[#allocation4 + $0x18] sm:$0xff] }
 0x6a5   : > { %2054 = vrcp.f32 %v1427_v14 }
 0x6a6   : > { %v1403_v29 = vpop.permute.xlu0 %1402 }
 0x6a8   : > { %v1399_v28 = vld [vmem:[#allocation5] sm:$0xff] }
 0x6a9   : > { %v1405_v30 = vmul.f32 %v1403_v29, %v1399_v28 }
 0x6aa   : > { %v1413_v32 = vpop.permute.xlu0 %1412 }
 0x6ab   : > { %1406 = vst.msk [vmem:[#allocation5] sm:$0xff] %vm618_vm5, %v1405_v30 }
 0x6af   : > { %v2055_v18 = vpop.eup %2054 }
 0x6b0   : > { %1432 = vperm.xlu1 %2047, %v2055_v18  }
 0x6b2   : > { %v1409_v31 = vld [vmem:[#allocation5] sm:$0xff] }
 0x6b3   : > { %v1415_v33 = vmul.f32 %v1413_v32, %v1409_v31 }
 0x6b5   : > { %1416 = vst.msk [vmem:[#allocation5] sm:$0xff] %vm998_vm7, %v1415_v33 }
 0x6bc   : > { %v1419_v35 = vld [vmem:[#allocation5] sm:$0xff] }
 0x6bd   : > { %v1425_v36 = vmul.f32 %v1423_v34, %v1419_v35 }
 0x6bf   : > { %1426 = vst.msk [vmem:[#allocation5] sm:$0xff] %vm1194_vm8, %v1425_v36 }
 0x6c6   : > { %v1429_v38 = vld [vmem:[#allocation5] sm:$0xff] }
 0x72f   : > { %v1433_v37 = vpop.permute.xlu1 %1432 }
 0x730   : > { %v1435_v20 = vmul.f32 %v1433_v37, %v1429_v38 }
 0x732   : > { %1436 = vst.msk [vmem:[#allocation5] sm:$0xff] %vm1390_vm9, %v1435_v20 }
 0x739   : > { %v1437_v39 = vld [vmem:[#allocation5] sm:$0xff] }
 0x73a   : > { %1830 = vmatmul.mubr.msk.f32.vlgmr.msra.gmra.mrb[0].mxu0 %vm543_vm4, %v1437_v39 }
 0x80d   : > { %v1518_v41 = vpop.f32.mrb[0].mxu0 }
 0x80e   : > { %v1519_v42 = vadd.f32 %v1721_v40, %v1518_v41  ;;  %v1831_v43 = vpop.f32.mrb[1].mxu0 }
 0x810   : > { %1522 = vst.msk [vmem:[%s2795_s12] sm:$0xff] %vm543_vm4, %v1519_v42 }
 0x811 PF: > { %s3064_s23 = sld [smem:[#allocation24_spill]]  ;;  %s3065_s25 = sld [smem:[#allocation23_spill]] }
 0x812   : > { %s3066_s27 = sld [smem:[#allocation28_spill]]  ;;  %s1539_s5 = sshll.u32 %s2795_s12, 4  ;;  %s2921_s5 = int_to_ptr.vmem [resolvable:$true] %s1539_s5 }
 0x813   : > { %s3067_s4 = sld [smem:[#allocation37_spill]]  ;;  %s1524_s8 = scalar_lea.sflag [#allocation8], %s2768_s7 }
 0x814   : > { %s2200_s18 = scalar_lea.vmem %s2921_s5, 128  ;;  %s2381_s26 = smov [#allocation15]  }
 0x815   : > { %p2201_p7 = scmp.ne.s32.totalorder %s2921_s5, %s2200_s18  ;;  %s2204_s19 = sshll.u32 %s2381_s26, 4  ;;  %s2205_s19 = int_to_ptr.vmem [resolvable:$false] %s2204_s19 }
 0x816   : > { %s2206_s12 = scalar_lea.vmem %s2205_s19, 256  ;;  %p2207_p8 = scmp.lt.s32.totalorder %s2921_s5, %s2205_s19 }
 0x817   : > { %s1724_s21 = sshll.u32 %s3064_s23, 1  ;;  %p2208_p10 = scmp.lt.s32.totalorder %s2206_s12, %s2200_s18 }
 0x818   : > { %s1535_s1 = sadd.s32 %s3065_s25, %s1724_s21  ;;  %p3068_p2 = scmp.ne.s32.totalorder %s3066_s27, 0 }
 0x819   : > { %s1725_s20 = sshll.u32 %s1535_s1, 7  ;;  %p2209_p9 = por %p2208_p10, %p2207_p8 }
 0x81a   : > { %s1537_s6 = scalar_lea.hbm %s3067_s4, %s1725_s20  ;;  %p2202_p6 = pnand %p2201_p7, %p3068_p2 }
 0x81c   : > { %p2203_p5 = pneg %p2202_p6 }
 0x81e   : > { %p2210_p1 = pnand %p2209_p9, %p2203_p5 }
 0x820   : > { %2213 = shalt.err (!%p2210_p1)
}
 0x821   : > { %s2214_s13 = scalar_lea.hbm %s1537_s6, 128  ;;  %s2218_s25 = scalar_lea.hbm %s3067_s4, 512 }
 0x822   : > { %p2215_p11 = scmp.ne.s32.totalorder %s1537_s6, %s2214_s13  ;;  %p2219_p3 = scmp.lt.u32.totalorder %s1537_s6, %s3067_s4 }
 0x823   : > { %p2220_p13 = scmp.lt.u32.totalorder %s2218_s25, %s2214_s13  ;;  %p2222_p7 = scmp.lt.u32.totalorder %s2214_s13, %s1537_s6 }
 0x824   : > { %p2216_p0 = pnand %p2215_p11, %p3068_p2 }
 0x825   : > { %p2221_p4 = por %p2220_p13, %p2219_p3 }
 0x826   : > { %p2217_p12 = pneg %p2216_p0 }
 0x827   : > { %p2223_p6 = por %p2222_p7, %p2221_p4 }
 0x829   : > { %p2224_p5 = pnand %p2223_p6, %p2217_p12 }
 0x82b   : > { %2227 = shalt.err (!%p2224_p5)
}
 0x82c   : > { %1866 = dma.vmem_to_hbm [thread:$0]  (%p3068_p2), %s2921_s5, 128, %s1537_s6, %s1524_s8  }
 0x82d PF: > { %s3069_s20 = sld [smem:[#allocation21_spill]]  ;;  %s3070_s24 = sld [smem:[#allocation29_spill]] }
 0x82e   : > { %p1896_p8 = scmp.ge.s32.totalorder %s2350_s17, 2 }
 0x833   : > { %s1551_s3 = sand.u32 1, %s3069_s20   ;;  %p3071_p10 = scmp.ne.s32.totalorder %s3070_s24, 0 }
 0x834   : > { %s1552_s18 = scalar_lea.sflag [#allocation8], %s1551_s3 }
 0x835   : > { %p1886_p9 = pnand %p1896_p8, %p3071_p10 }
 0x837   : > { %2297 = dma.done.wait (!%p1886_p9), %s1552_s18, 128  }
 0x838   : > { %2299 = vsyncadd (!%p1886_p9), %s1552_s18, 4294967168  ;;  %s28_s17 = sadd.s32 1, %s2350_s17   ;;  %s3073_s5 = sld [smem:[#allocation26_spill]] }
 0x839   : > { %p2948_p1 = scmp.ge.s32.totalorder %s28_s17, 10   ;;  %s3074_s6 = sld [smem:[#allocation27_spill]] }
 0x83a   : > { %s3075_s8 = smov %s3097_s11  ;;  %s3076_s27 = smov %s2306_s28 }
 0x83b   : > { %s3077_s28 = smov %s2310_s29  ;;  %s3078_s29 = smov %s2710_s30 }
 0x83c   : > { %s3079_s30 = smov %s2318_s9  ;;  %s3080_s9 = smov %s2322_s10 }
 0x83d   : > { %s3081_s10 = smov %s2660_s2  ;;  %s3082_s11 = smov %s2338_s14 }
 0x83e   : > { %s3083_s12 = smov %s2342_s15  ;;  %s3084_s13 = smov %s2346_s16 }
 0x83f   : > { %s3085_s14 = smov %s3073_s5  ;;  %s3086_s15 = smov %s3074_s6 }
 0x840   : > { %s3087_s16 = smov %s3075_s8  ;;  %27 = sbr.rel (!%p2948_p1) target bundleno = 22 (0x16), region = 136 }
 0x847   :  { %1557 = vsyncpa [#allocation7], 1 }
 0x848   :  { %1559 = vsyncpa [#allocation7 + $0x1], 1 }
 0x849   :  { %1560 = vsyncpa [#allocation10], 1 }
 0x84a   :  { %1562 = vsyncpa [#allocation10 + $0x1], 1 }
 0x84b   :  { %1563 = vsyncpa [#allocation13], 1 }
 0x84c   :  { %1564 = vsyncpa [#allocation8], 1 }
 0x84d   :  { %1566 = vsyncpa [#allocation8 + $0x1], 1 }

</bundles_post_ra>
